<compile_context>
chip_gen: v7x
topology: tpu7x:2x2x1
jax: 0.10.0
libtpu: 0.0.40
codegen_flags: <defaults>
</compile_context>

<pallas_src>
import functools

import jax
import jax.numpy as jnp
from jax.experimental import pallas as pl
from jax.experimental.pallas import tpu as pltpu


def _round_up(x, m):
    return ((x + m - 1) // m) * m


def gru_value_kernel(x_ref, wih_ref, whh_ref, bgi_ref, bhn_ref, wout_ref, bout_ref,
                     out_ref, gi_ref, *, seq_len, batch_pad, hidden_pad):
    T, Bp, Hp = seq_len, batch_pad, hidden_pad
    f32 = jnp.float32

    # Hoisted input projection for ALL timesteps: one (T*Bp, Inp) x (Inp, 3*Hp) MXU pass.
    # Result goes to a VMEM scratch so its live range is bounded across the unrolled loop.
    gi_ref[...] = (jnp.dot(x_ref[...], wih_ref[...].astype(f32),
                           preferred_element_type=f32)
                   + bgi_ref[...])

    whh = whh_ref[...].astype(f32)                     # (Hp, 3*Hp), upcast + hoisted once
    bhn = jnp.broadcast_to(bhn_ref[...], (Bp, Hp))     # hoisted broadcast (b_hh_n)

    def step(h, gi):
        gh = jnp.dot(h, whh, preferred_element_type=f32)         # (Bp, 3*Hp)
        # Gate slices fall on 128-lane vreg boundaries -> no cross-lane shuffles.
        r = jax.nn.sigmoid(gi[:, 0:Hp] + gh[:, 0:Hp])
        z = jax.nn.sigmoid(gi[:, Hp:2 * Hp] + gh[:, Hp:2 * Hp])
        n = jnp.tanh(gi[:, 2 * Hp:3 * Hp] + r * (gh[:, 2 * Hp:3 * Hp] + bhn))
        return (1.0 - z) * n + z * h

    h = jnp.zeros((Bp, Hp), f32)
    if T <= 16:
        # Small T: fully unrolled; gi re-read from VMEM scratch each step (static,
        # sublane-aligned slice) so only h / whh stay live across steps.
        for t in range(T):
            h = step(h, gi_ref[pl.ds(t * Bp, Bp), :])
    else:
        # Larger T: modest unroll keeps LLO visibility while capping code size / vregs.
        def body(t, h):
            start = pl.multiple_of(t * Bp, Bp)
            return step(h, gi_ref[pl.ds(start, Bp), :])
        h = jax.lax.fori_loop(0, T, body, h, unroll=4)

    # Linear head on the last hidden state; lane-dense (Bp, Ap) store.
    head = (jnp.dot(h, wout_ref[...].astype(f32), preferred_element_type=f32)
            + bout_ref[...])
    out_ref[...] = head.astype(out_ref.dtype)


def prepare_gru_value_params(params, hidden_dim, num_actions, input_dim):
    """One-time parameter prep (padding, transposes, bias folding, bf16 weight storage).

    Call this ONCE; pass the result to gru_value_estimator on every forward.
    """
    H, A, In = hidden_dim, num_actions, input_dim
    Hp = _round_up(H, 128)       # each gate block padded to a 128-lane boundary
    Ap = _round_up(A, 128)       # lane-dense head output
    Inp = _round_up(In, 8)       # sublane-friendly K for the input projection
    f32, bf16 = jnp.float32, jnp.bfloat16

    w_ih_t = jnp.asarray(params["w_ih"], f32).T          # (In, 3H)
    w_hh_t = jnp.asarray(params["w_hh"], f32).T          # (H, 3H)
    b_ih = jnp.asarray(params["b_ih"], f32)
    b_hh = jnp.asarray(params["b_hh"], f32)

    # Lane-aligned (gate-padded) weights: gate g occupies lanes [g*Hp, g*Hp + H).
    wih_p = jnp.zeros((Inp, 3 * Hp), f32)
    whh_p = jnp.zeros((Hp, 3 * Hp), f32)
    for g in range(3):
        wih_p = wih_p.at[:In, g * Hp:g * Hp + H].set(w_ih_t[:, g * H:(g + 1) * H])
        whh_p = whh_p.at[:H, g * Hp:g * Hp + H].set(w_hh_t[:, g * H:(g + 1) * H])

    # Fold b_hh into the input-side bias for r/z; keep b_hh_n separate (inside r*(...)).
    bgi_p = jnp.zeros((1, 3 * Hp), f32)
    bgi_p = bgi_p.at[0, 0 * Hp:0 * Hp + H].set(b_ih[0 * H:1 * H] + b_hh[0 * H:1 * H])
    bgi_p = bgi_p.at[0, 1 * Hp:1 * Hp + H].set(b_ih[1 * H:2 * H] + b_hh[1 * H:2 * H])
    bgi_p = bgi_p.at[0, 2 * Hp:2 * Hp + H].set(b_ih[2 * H:3 * H])
    bhn_p = jnp.zeros((1, Hp), f32).at[0, :H].set(b_hh[2 * H:3 * H])

    # Head weights padded to lane-dense output (A -> Ap), zero rows beyond H.
    wout_p = jnp.zeros((Hp, Ap), f32).at[:H, :A].set(jnp.asarray(params["w_out"], f32).T)
    bout_p = jnp.zeros((1, Ap), f32).at[0, :A].set(jnp.asarray(params["b_out"], f32))

    # Matmul weight operands stored in bf16 (halves weight DMA); biases stay f32.
    return {
        "wih": wih_p.astype(bf16),
        "whh": whh_p.astype(bf16),
        "wout": wout_p.astype(bf16),
        "bgi": bgi_p,
        "bhn": bhn_p,
        "bout": bout_p,
    }


@functools.partial(jax.jit, static_argnames=("num_actions",))
def gru_value_estimator(lidar_states_batch, target_points_batch, prep, num_actions):
    # Glue (plain JAX, fused under jit): squeeze(2) + per-step concat + stack
    # == concat on the last axis.
    x = jnp.concatenate(
        [jnp.squeeze(lidar_states_batch, axis=2), target_points_batch],
        axis=-1).astype(jnp.float32)
    T, B, In = x.shape
    A = num_actions

    Hp = prep["whh"].shape[0]
    Ap = prep["wout"].shape[1]
    Inp = prep["wih"].shape[0]
    Bp = _round_up(B, 8)

    # Pad batch to a sublane multiple and input features to the prepped K, then flatten
    # time into rows for the hoisted projection (single pad op).
    x2 = jnp.pad(x, ((0, 0), (0, Bp - B), (0, Inp - In))).reshape(T * Bp, Inp)

    kernel = functools.partial(gru_value_kernel, seq_len=T, batch_pad=Bp, hidden_pad=Hp)
    vmem = pl.BlockSpec(memory_space=pltpu.MemorySpace.VMEM)

    out_padded = pl.pallas_call(
        kernel,
        out_shape=jax.ShapeDtypeStruct((Bp, Ap), jnp.float32),
        in_specs=[vmem] * 7,                 # whole-array operands, explicit VMEM residency
        out_specs=vmem,
        scratch_shapes=[pltpu.VMEM((T * Bp, 3 * Hp), jnp.float32)],  # hoisted projection
        # TODO(synk): if batch ever grows large, add a batch grid axis with
        # dimension_semantics=("parallel",) to use both v7x TensorCores.
    )(x2, prep["wih"], prep["whh"], prep["bgi"], prep["bhn"],
      prep["wout"], prep["bout"])

    return out_padded[:B, :A]


def reference_forward(lidar_states_batch, target_points_batch, params, hidden_dim):
    """Pure-JAX reference matching torch.nn.GRU + Linear semantics."""
    x = jnp.concatenate(
        [jnp.squeeze(lidar_states_batch, axis=2), target_points_batch], axis=-1)
    B = x.shape[1]
    H = hidden_dim

    def step(h, x_t):
        gi = x_t @ params["w_ih"].T + params["b_ih"]
        gh = h @ params["w_hh"].T + params["b_hh"]
        i_r, i_z, i_n = jnp.split(gi, 3, axis=-1)
        h_r, h_z, h_n = jnp.split(gh, 3, axis=-1)
        r = jax.nn.sigmoid(i_r + h_r)
        z = jax.nn.sigmoid(i_z + h_z)
        n = jnp.tanh(i_n + r * h_n)
        h_new = (1.0 - z) * n + z * h
        return h_new, None

    h0 = jnp.zeros((B, H), jnp.float32)
    h_last, _ = jax.lax.scan(step, h0, x)
    return h_last @ params["w_out"].T + params["b_out"]


if __name__ == "__main__":
    # Small shapes consistent with the module: state_shape = (_, 16) -> GRU input = 18.
    T, B, S = 8, 2, 16
    hidden_dim, num_actions = 32, 4
    in_dim = S + 2

    key = jax.random.PRNGKey(0)
    k_lidar, k_tp, k1, k2, k3, k4, k5, k6 = jax.random.split(key, 8)

    lidar_states_batch = jax.random.normal(k_lidar, (T, B, 1, S), dtype=jnp.float32)
    target_points_batch = jax.random.normal(k_tp, (T, B, 2), dtype=jnp.float32)

    # Deterministic parameter init (same shapes / uniform range as PyTorch defaults).
    bound = 1.0 / jnp.sqrt(jnp.float32(hidden_dim))
    params = {
        "w_ih": jax.random.uniform(k1, (3 * hidden_dim, in_dim), jnp.float32, -bound, bound),
        "w_hh": jax.random.uniform(k2, (3 * hidden_dim, hidden_dim), jnp.float32, -bound, bound),
        "b_ih": jax.random.uniform(k3, (3 * hidden_dim,), jnp.float32, -bound, bound),
        "b_hh": jax.random.uniform(k4, (3 * hidden_dim,), jnp.float32, -bound, bound),
        "w_out": jax.random.uniform(k5, (num_actions, hidden_dim), jnp.float32, -bound, bound),
        "b_out": jax.random.uniform(k6, (num_actions,), jnp.float32, -bound, bound),
    }

    # One-time parameter preparation (hoisted out of the per-call hot path).
    prep = prepare_gru_value_params(params, hidden_dim, num_actions, in_dim)
    prep = jax.block_until_ready(prep)

    out = gru_value_estimator(lidar_states_batch, target_points_batch, prep, num_actions)
    out = jax.block_until_ready(out)
    assert out.shape == (B, num_actions)

    # Tight logic check: reference using the SAME bf16-rounded matmul weights the kernel uses.
    def _bf16_round(w):
        return w.astype(jnp.bfloat16).astype(jnp.float32)

    params_bf16w = dict(params)
    params_bf16w["w_ih"] = _bf16_round(params["w_ih"])
    params_bf16w["w_hh"] = _bf16_round(params["w_hh"])
    params_bf16w["w_out"] = _bf16_round(params["w_out"])
    ref_bf16 = reference_forward(lidar_states_batch, target_points_batch,
                                 params_bf16w, hidden_dim)
    assert jnp.allclose(out, ref_bf16, atol=2e-2, rtol=2e-2), (out, ref_bf16)

    # Semantic check vs the full-f32 reference (loosened for bf16 weight storage).
    ref_f32 = reference_forward(lidar_states_batch, target_points_batch,
                                params, hidden_dim)
    assert jnp.allclose(out, ref_f32, atol=6e-2, rtol=6e-2), (out, ref_f32)

    print("KERNEL_OK")
</pallas_src>

<mosaic_0001>
module attributes {stable_mosaic.version = 11 : i64} {
  func.func @gru_value_kernel(%arg0: memref<64x24xf32, #tpu.memory_space<vmem>>, %arg1: memref<24x384xbf16, #tpu.memory_space<vmem>>, %arg2: memref<128x384xbf16, #tpu.memory_space<vmem>>, %arg3: memref<1x384xf32, #tpu.memory_space<vmem>>, %arg4: memref<1x128xf32, #tpu.memory_space<vmem>>, %arg5: memref<128x128xbf16, #tpu.memory_space<vmem>>, %arg6: memref<1x128xf32, #tpu.memory_space<vmem>>, %arg7: memref<8x128xf32, #tpu.memory_space<vmem>>, %arg8: memref<64x384xf32, #tpu.memory_space<vmem>>) attributes {dimension_semantics = [], scalar_prefetch = 0 : i64, scratch_operands = 1 : i64, tpu.core_type = #tpu.core_type<tc>} {
    %c0 = arith.constant 0 : index
    %c0_0 = arith.constant 0 : index
    %0 = vector.load %arg0[%c0, %c0_0] : memref<64x24xf32, #tpu.memory_space<vmem>>, vector<64x24xf32>
    %c0_1 = arith.constant 0 : index
    %c0_2 = arith.constant 0 : index
    %1 = vector.load %arg1[%c0_1, %c0_2] : memref<24x384xbf16, #tpu.memory_space<vmem>>, vector<24x384xbf16>
    %2 = arith.extf %1 : vector<24x384xbf16> to vector<24x384xf32>
    %cst = arith.constant dense<0.000000e+00> : vector<64x384xf32>
    %3 = tpu.matmul %0, %2, %cst {dimension_numbers = #tpu.dot_dimension_numbers<[1], [0], [0], [1], [0, 0, 1, 1], [], []>} : vector<64x24xf32>, vector<24x384xf32>, vector<64x384xf32> -> vector<64x384xf32>
    %c0_3 = arith.constant 0 : index
    %c0_4 = arith.constant 0 : index
    %4 = vector.load %arg3[%c0_3, %c0_4] : memref<1x384xf32, #tpu.memory_space<vmem>>, vector<1x384xf32>
    %5 = vector.broadcast %4 : vector<1x384xf32> to vector<64x384xf32>
    %6 = arith.addf %3, %5 : vector<64x384xf32>
    %c0_5 = arith.constant 0 : index
    %c0_6 = arith.constant 0 : index
    %7 = vector.load %arg8[%c0_5, %c0_6] : memref<64x384xf32, #tpu.memory_space<vmem>>, vector<64x384xf32>
    tpu.vector_store %arg8[%c0_5, %c0_6], %6 {strides = array<i32>} : memref<64x384xf32, #tpu.memory_space<vmem>>, vector<64x384xf32>,
    %c0_7 = arith.constant 0 : index
    %c0_8 = arith.constant 0 : index
    %8 = vector.load %arg2[%c0_7, %c0_8] : memref<128x384xbf16, #tpu.memory_space<vmem>>, vector<128x384xbf16>
    %9 = arith.extf %8 : vector<128x384xbf16> to vector<128x384xf32>
    %c0_9 = arith.constant 0 : index
    %c0_10 = arith.constant 0 : index
    %10 = vector.load %arg4[%c0_9, %c0_10] : memref<1x128xf32, #tpu.memory_space<vmem>>, vector<1x128xf32>
    %11 = vector.shape_cast %10 : vector<1x128xf32> to vector<1x128xf32>
    %12 = vector.broadcast %11 : vector<1x128xf32> to vector<8x128xf32>
    %cst_11 = arith.constant 0.000000e+00 : f32
    %13 = vector.broadcast %cst_11 : f32 to vector<8x128xf32>
    %c0_12 = arith.constant 0 : index
    %c0_13 = arith.constant 0 : index
    %14 = vector.load %arg8[%c0_12, %c0_13] : memref<64x384xf32, #tpu.memory_space<vmem>>, vector<8x384xf32>
    %cst_14 = arith.constant dense<0.000000e+00> : vector<8x384xf32>
    %15 = tpu.matmul %13, %9, %cst_14 {dimension_numbers = #tpu.dot_dimension_numbers<[1], [0], [0], [1], [0, 0, 1, 1], [], []>} : vector<8x128xf32>, vector<128x384xf32>, vector<8x384xf32> -> vector<8x384xf32>
    %16 = vector.extract_strided_slice %14 {offsets = [0, 0], sizes = [8, 128], strides = [1, 1]} : vector<8x384xf32> to vector<8x128xf32>
    %17 = vector.extract_strided_slice %15 {offsets = [0, 0], sizes = [8, 128], strides = [1, 1]} : vector<8x384xf32> to vector<8x128xf32>
    %18 = arith.addf %16, %17 : vector<8x128xf32>
    %19 = arith.negf %18 : vector<8x128xf32>
    %20 = math.exp %19 : vector<8x128xf32>
    %cst_15 = arith.constant 1.000000e+00 : f32
    %21 = vector.broadcast %cst_15 : f32 to vector<8x128xf32>
    %22 = arith.addf %21, %20 : vector<8x128xf32>
    %23 = arith.divf %21, %22 : vector<8x128xf32>
    %24 = vector.extract_strided_slice %14 {offsets = [0, 128], sizes = [8, 128], strides = [1, 1]} : vector<8x384xf32> to vector<8x128xf32>
    %25 = vector.extract_strided_slice %15 {offsets = [0, 128], sizes = [8, 128], strides = [1, 1]} : vector<8x384xf32> to vector<8x128xf32>
    %26 = arith.addf %24, %25 : vector<8x128xf32>
    %27 = arith.negf %26 : vector<8x128xf32>
    %28 = math.exp %27 : vector<8x128xf32>
    %cst_16 = arith.constant 1.000000e+00 : f32
    %29 = vector.broadcast %cst_16 : f32 to vector<8x128xf32>
    %30 = arith.addf %29, %28 : vector<8x128xf32>
    %31 = arith.divf %29, %30 : vector<8x128xf32>
    %32 = vector.extract_strided_slice %14 {offsets = [0, 256], sizes = [8, 128], strides = [1, 1]} : vector<8x384xf32> to vector<8x128xf32>
    %33 = vector.extract_strided_slice %15 {offsets = [0, 256], sizes = [8, 128], strides = [1, 1]} : vector<8x384xf32> to vector<8x128xf32>
    %34 = arith.addf %33, %12 : vector<8x128xf32>
    %35 = arith.mulf %23, %34 : vector<8x128xf32>
    %36 = arith.addf %32, %35 : vector<8x128xf32>
    %37 = math.tanh %36 : vector<8x128xf32>
    %cst_17 = arith.constant 1.000000e+00 : f32
    %38 = vector.broadcast %cst_17 : f32 to vector<8x128xf32>
    %39 = arith.subf %38, %31 : vector<8x128xf32>
    %40 = arith.mulf %39, %37 : vector<8x128xf32>
    %41 = arith.mulf %31, %13 : vector<8x128xf32>
    %42 = arith.addf %40, %41 : vector<8x128xf32>
    %c8 = arith.constant 8 : index
    %c0_18 = arith.constant 0 : index
    %43 = vector.load %arg8[%c8, %c0_18] : memref<64x384xf32, #tpu.memory_space<vmem>>, vector<8x384xf32>
    %cst_19 = arith.constant dense<0.000000e+00> : vector<8x384xf32>
    %44 = tpu.matmul %42, %9, %cst_19 {dimension_numbers = #tpu.dot_dimension_numbers<[1], [0], [0], [1], [0, 0, 1, 1], [], []>} : vector<8x128xf32>, vector<128x384xf32>, vector<8x384xf32> -> vector<8x384xf32>
    %45 = vector.extract_strided_slice %43 {offsets = [0, 0], sizes = [8, 128], strides = [1, 1]} : vector<8x384xf32> to vector<8x128xf32>
    %46 = vector.extract_strided_slice %44 {offsets = [0, 0], sizes = [8, 128], strides = [1, 1]} : vector<8x384xf32> to vector<8x128xf32>
    %47 = arith.addf %45, %46 : vector<8x128xf32>
    %48 = arith.negf %47 : vector<8x128xf32>
    %49 = math.exp %48 : vector<8x128xf32>
    %cst_20 = arith.constant 1.000000e+00 : f32
    %50 = vector.broadcast %cst_20 : f32 to vector<8x128xf32>
    %51 = arith.addf %50, %49 : vector<8x128xf32>
    %52 = arith.divf %50, %51 : vector<8x128xf32>
    %53 = vector.extract_strided_slice %43 {offsets = [0, 128], sizes = [8, 128], strides = [1, 1]} : vector<8x384xf32> to vector<8x128xf32>
    %54 = vector.extract_strided_slice %44 {offsets = [0, 128], sizes = [8, 128], strides = [1, 1]} : vector<8x384xf32> to vector<8x128xf32>
    %55 = arith.addf %53, %54 : vector<8x128xf32>
    %56 = arith.negf %55 : vector<8x128xf32>
    %57 = math.exp %56 : vector<8x128xf32>
    %cst_21 = arith.constant 1.000000e+00 : f32
    %58 = vector.broadcast %cst_21 : f32 to vector<8x128xf32>
    %59 = arith.addf %58, %57 : vector<8x128xf32>
    %60 = arith.divf %58, %59 : vector<8x128xf32>
    %61 = vector.extract_strided_slice %43 {offsets = [0, 256], sizes = [8, 128], strides = [1, 1]} : vector<8x384xf32> to vector<8x128xf32>
    %62 = vector.extract_strided_slice %44 {offsets = [0, 256], sizes = [8, 128], strides = [1, 1]} : vector<8x384xf32> to vector<8x128xf32>
    %63 = arith.addf %62, %12 : vector<8x128xf32>
    %64 = arith.mulf %52, %63 : vector<8x128xf32>
    %65 = arith.addf %61, %64 : vector<8x128xf32>
    %66 = math.tanh %65 : vector<8x128xf32>
    %cst_22 = arith.constant 1.000000e+00 : f32
    %67 = vector.broadcast %cst_22 : f32 to vector<8x128xf32>
    %68 = arith.subf %67, %60 : vector<8x128xf32>
    %69 = arith.mulf %68, %66 : vector<8x128xf32>
    %70 = arith.mulf %60, %42 : vector<8x128xf32>
    %71 = arith.addf %69, %70 : vector<8x128xf32>
    %c16 = arith.constant 16 : index
    %c0_23 = arith.constant 0 : index
    %72 = vector.load %arg8[%c16, %c0_23] : memref<64x384xf32, #tpu.memory_space<vmem>>, vector<8x384xf32>
    %cst_24 = arith.constant dense<0.000000e+00> : vector<8x384xf32>
    %73 = tpu.matmul %71, %9, %cst_24 {dimension_numbers = #tpu.dot_dimension_numbers<[1], [0], [0], [1], [0, 0, 1, 1], [], []>} : vector<8x128xf32>, vector<128x384xf32>, vector<8x384xf32> -> vector<8x384xf32>
    %74 = vector.extract_strided_slice %72 {offsets = [0, 0], sizes = [8, 128], strides = [1, 1]} : vector<8x384xf32> to vector<8x128xf32>
    %75 = vector.extract_strided_slice %73 {offsets = [0, 0], sizes = [8, 128], strides = [1, 1]} : vector<8x384xf32> to vector<8x128xf32>
    %76 = arith.addf %74, %75 : vector<8x128xf32>
    %77 = arith.negf %76 : vector<8x128xf32>
    %78 = math.exp %77 : vector<8x128xf32>
    %cst_25 = arith.constant 1.000000e+00 : f32
    %79 = vector.broadcast %cst_25 : f32 to vector<8x128xf32>
    %80 = arith.addf %79, %78 : vector<8x128xf32>
    %81 = arith.divf %79, %80 : vector<8x128xf32>
    %82 = vector.extract_strided_slice %72 {offsets = [0, 128], sizes = [8, 128], strides = [1, 1]} : vector<8x384xf32> to vector<8x128xf32>
    %83 = vector.extract_strided_slice %73 {offsets = [0, 128], sizes = [8, 128], strides = [1, 1]} : vector<8x384xf32> to vector<8x128xf32>
    %84 = arith.addf %82, %83 : vector<8x128xf32>
    %85 = arith.negf %84 : vector<8x128xf32>
    %86 = math.exp %85 : vector<8x128xf32>
    %cst_26 = arith.constant 1.000000e+00 : f32
    %87 = vector.broadcast %cst_26 : f32 to vector<8x128xf32>
    %88 = arith.addf %87, %86 : vector<8x128xf32>
    %89 = arith.divf %87, %88 : vector<8x128xf32>
    %90 = vector.extract_strided_slice %72 {offsets = [0, 256], sizes = [8, 128], strides = [1, 1]} : vector<8x384xf32> to vector<8x128xf32>
    %91 = vector.extract_strided_slice %73 {offsets = [0, 256], sizes = [8, 128], strides = [1, 1]} : vector<8x384xf32> to vector<8x128xf32>
    %92 = arith.addf %91, %12 : vector<8x128xf32>
    %93 = arith.mulf %81, %92 : vector<8x128xf32>
    %94 = arith.addf %90, %93 : vector<8x128xf32>
    %95 = math.tanh %94 : vector<8x128xf32>
    %cst_27 = arith.constant 1.000000e+00 : f32
    %96 = vector.broadcast %cst_27 : f32 to vector<8x128xf32>
    %97 = arith.subf %96, %89 : vector<8x128xf32>
    %98 = arith.mulf %97, %95 : vector<8x128xf32>
    %99 = arith.mulf %89, %71 : vector<8x128xf32>
    %100 = arith.addf %98, %99 : vector<8x128xf32>
    %c24 = arith.constant 24 : index
    %c0_28 = arith.constant 0 : index
    %101 = vector.load %arg8[%c24, %c0_28] : memref<64x384xf32, #tpu.memory_space<vmem>>, vector<8x384xf32>
    %cst_29 = arith.constant dense<0.000000e+00> : vector<8x384xf32>
    %102 = tpu.matmul %100, %9, %cst_29 {dimension_numbers = #tpu.dot_dimension_numbers<[1], [0], [0], [1], [0, 0, 1, 1], [], []>} : vector<8x128xf32>, vector<128x384xf32>, vector<8x384xf32> -> vector<8x384xf32>
    %103 = vector.extract_strided_slice %101 {offsets = [0, 0], sizes = [8, 128], strides = [1, 1]} : vector<8x384xf32> to vector<8x128xf32>
    %104 = vector.extract_strided_slice %102 {offsets = [0, 0], sizes = [8, 128], strides = [1, 1]} : vector<8x384xf32> to vector<8x128xf32>
    %105 = arith.addf %103, %104 : vector<8x128xf32>
    %106 = arith.negf %105 : vector<8x128xf32>
    %107 = math.exp %106 : vector<8x128xf32>
    %cst_30 = arith.constant 1.000000e+00 : f32
    %108 = vector.broadcast %cst_30 : f32 to vector<8x128xf32>
    %109 = arith.addf %108, %107 : vector<8x128xf32>
    %110 = arith.divf %108, %109 : vector<8x128xf32>
    %111 = vector.extract_strided_slice %101 {offsets = [0, 128], sizes = [8, 128], strides = [1, 1]} : vector<8x384xf32> to vector<8x128xf32>
    %112 = vector.extract_strided_slice %102 {offsets = [0, 128], sizes = [8, 128], strides = [1, 1]} : vector<8x384xf32> to vector<8x128xf32>
    %113 = arith.addf %111, %112 : vector<8x128xf32>
    %114 = arith.negf %113 : vector<8x128xf32>
    %115 = math.exp %114 : vector<8x128xf32>
    %cst_31 = arith.constant 1.000000e+00 : f32
    %116 = vector.broadcast %cst_31 : f32 to vector<8x128xf32>
    %117 = arith.addf %116, %115 : vector<8x128xf32>
    %118 = arith.divf %116, %117 : vector<8x128xf32>
    %119 = vector.extract_strided_slice %101 {offsets = [0, 256], sizes = [8, 128], strides = [1, 1]} : vector<8x384xf32> to vector<8x128xf32>
    %120 = vector.extract_strided_slice %102 {offsets = [0, 256], sizes = [8, 128], strides = [1, 1]} : vector<8x384xf32> to vector<8x128xf32>
    %121 = arith.addf %120, %12 : vector<8x128xf32>
    %122 = arith.mulf %110, %121 : vector<8x128xf32>
    %123 = arith.addf %119, %122 : vector<8x128xf32>
    %124 = math.tanh %123 : vector<8x128xf32>
    %cst_32 = arith.constant 1.000000e+00 : f32
    %125 = vector.broadcast %cst_32 : f32 to vector<8x128xf32>
    %126 = arith.subf %125, %118 : vector<8x128xf32>
    %127 = arith.mulf %126, %124 : vector<8x128xf32>
    %128 = arith.mulf %118, %100 : vector<8x128xf32>
    %129 = arith.addf %127, %128 : vector<8x128xf32>
    %c32 = arith.constant 32 : index
    %c0_33 = arith.constant 0 : index
    %130 = vector.load %arg8[%c32, %c0_33] : memref<64x384xf32, #tpu.memory_space<vmem>>, vector<8x384xf32>
    %cst_34 = arith.constant dense<0.000000e+00> : vector<8x384xf32>
    %131 = tpu.matmul %129, %9, %cst_34 {dimension_numbers = #tpu.dot_dimension_numbers<[1], [0], [0], [1], [0, 0, 1, 1], [], []>} : vector<8x128xf32>, vector<128x384xf32>, vector<8x384xf32> -> vector<8x384xf32>
    %132 = vector.extract_strided_slice %130 {offsets = [0, 0], sizes = [8, 128], strides = [1, 1]} : vector<8x384xf32> to vector<8x128xf32>
    %133 = vector.extract_strided_slice %131 {offsets = [0, 0], sizes = [8, 128], strides = [1, 1]} : vector<8x384xf32> to vector<8x128xf32>
    %134 = arith.addf %132, %133 : vector<8x128xf32>
    %135 = arith.negf %134 : vector<8x128xf32>
    %136 = math.exp %135 : vector<8x128xf32>
    %cst_35 = arith.constant 1.000000e+00 : f32
    %137 = vector.broadcast %cst_35 : f32 to vector<8x128xf32>
    %138 = arith.addf %137, %136 : vector<8x128xf32>
    %139 = arith.divf %137, %138 : vector<8x128xf32>
    %140 = vector.extract_strided_slice %130 {offsets = [0, 128], sizes = [8, 128], strides = [1, 1]} : vector<8x384xf32> to vector<8x128xf32>
    %141 = vector.extract_strided_slice %131 {offsets = [0, 128], sizes = [8, 128], strides = [1, 1]} : vector<8x384xf32> to vector<8x128xf32>
    %142 = arith.addf %140, %141 : vector<8x128xf32>
    %143 = arith.negf %142 : vector<8x128xf32>
    %144 = math.exp %143 : vector<8x128xf32>
    %cst_36 = arith.constant 1.000000e+00 : f32
    %145 = vector.broadcast %cst_36 : f32 to vector<8x128xf32>
    %146 = arith.addf %145, %144 : vector<8x128xf32>
    %147 = arith.divf %145, %146 : vector<8x128xf32>
    %148 = vector.extract_strided_slice %130 {offsets = [0, 256], sizes = [8, 128], strides = [1, 1]} : vector<8x384xf32> to vector<8x128xf32>
    %149 = vector.extract_strided_slice %131 {offsets = [0, 256], sizes = [8, 128], strides = [1, 1]} : vector<8x384xf32> to vector<8x128xf32>
    %150 = arith.addf %149, %12 : vector<8x128xf32>
    %151 = arith.mulf %139, %150 : vector<8x128xf32>
    %152 = arith.addf %148, %151 : vector<8x128xf32>
    %153 = math.tanh %152 : vector<8x128xf32>
    %cst_37 = arith.constant 1.000000e+00 : f32
    %154 = vector.broadcast %cst_37 : f32 to vector<8x128xf32>
    %155 = arith.subf %154, %147 : vector<8x128xf32>
    %156 = arith.mulf %155, %153 : vector<8x128xf32>
    %157 = arith.mulf %147, %129 : vector<8x128xf32>
    %158 = arith.addf %156, %157 : vector<8x128xf32>
    %c40 = arith.constant 40 : index
    %c0_38 = arith.constant 0 : index
    %159 = vector.load %arg8[%c40, %c0_38] : memref<64x384xf32, #tpu.memory_space<vmem>>, vector<8x384xf32>
    %cst_39 = arith.constant dense<0.000000e+00> : vector<8x384xf32>
    %160 = tpu.matmul %158, %9, %cst_39 {dimension_numbers = #tpu.dot_dimension_numbers<[1], [0], [0], [1], [0, 0, 1, 1], [], []>} : vector<8x128xf32>, vector<128x384xf32>, vector<8x384xf32> -> vector<8x384xf32>
    %161 = vector.extract_strided_slice %159 {offsets = [0, 0], sizes = [8, 128], strides = [1, 1]} : vector<8x384xf32> to vector<8x128xf32>
    %162 = vector.extract_strided_slice %160 {offsets = [0, 0], sizes = [8, 128], strides = [1, 1]} : vector<8x384xf32> to vector<8x128xf32>
    %163 = arith.addf %161, %162 : vector<8x128xf32>
    %164 = arith.negf %163 : vector<8x128xf32>
    %165 = math.exp %164 : vector<8x128xf32>
    %cst_40 = arith.constant 1.000000e+00 : f32
    %166 = vector.broadcast %cst_40 : f32 to vector<8x128xf32>
    %167 = arith.addf %166, %165 : vector<8x128xf32>
    %168 = arith.divf %166, %167 : vector<8x128xf32>
    %169 = vector.extract_strided_slice %159 {offsets = [0, 128], sizes = [8, 128], strides = [1, 1]} : vector<8x384xf32> to vector<8x128xf32>
    %170 = vector.extract_strided_slice %160 {offsets = [0, 128], sizes = [8, 128], strides = [1, 1]} : vector<8x384xf32> to vector<8x128xf32>
    %171 = arith.addf %169, %170 : vector<8x128xf32>
    %172 = arith.negf %171 : vector<8x128xf32>
    %173 = math.exp %172 : vector<8x128xf32>
    %cst_41 = arith.constant 1.000000e+00 : f32
    %174 = vector.broadcast %cst_41 : f32 to vector<8x128xf32>
    %175 = arith.addf %174, %173 : vector<8x128xf32>
    %176 = arith.divf %174, %175 : vector<8x128xf32>
    %177 = vector.extract_strided_slice %159 {offsets = [0, 256], sizes = [8, 128], strides = [1, 1]} : vector<8x384xf32> to vector<8x128xf32>
    %178 = vector.extract_strided_slice %160 {offsets = [0, 256], sizes = [8, 128], strides = [1, 1]} : vector<8x384xf32> to vector<8x128xf32>
    %179 = arith.addf %178, %12 : vector<8x128xf32>
    %180 = arith.mulf %168, %179 : vector<8x128xf32>
    %181 = arith.addf %177, %180 : vector<8x128xf32>
    %182 = math.tanh %181 : vector<8x128xf32>
    %cst_42 = arith.constant 1.000000e+00 : f32
    %183 = vector.broadcast %cst_42 : f32 to vector<8x128xf32>
    %184 = arith.subf %183, %176 : vector<8x128xf32>
    %185 = arith.mulf %184, %182 : vector<8x128xf32>
    %186 = arith.mulf %176, %158 : vector<8x128xf32>
    %187 = arith.addf %185, %186 : vector<8x128xf32>
    %c48 = arith.constant 48 : index
    %c0_43 = arith.constant 0 : index
    %188 = vector.load %arg8[%c48, %c0_43] : memref<64x384xf32, #tpu.memory_space<vmem>>, vector<8x384xf32>
    %cst_44 = arith.constant dense<0.000000e+00> : vector<8x384xf32>
    %189 = tpu.matmul %187, %9, %cst_44 {dimension_numbers = #tpu.dot_dimension_numbers<[1], [0], [0], [1], [0, 0, 1, 1], [], []>} : vector<8x128xf32>, vector<128x384xf32>, vector<8x384xf32> -> vector<8x384xf32>
    %190 = vector.extract_strided_slice %188 {offsets = [0, 0], sizes = [8, 128], strides = [1, 1]} : vector<8x384xf32> to vector<8x128xf32>
    %191 = vector.extract_strided_slice %189 {offsets = [0, 0], sizes = [8, 128], strides = [1, 1]} : vector<8x384xf32> to vector<8x128xf32>
    %192 = arith.addf %190, %191 : vector<8x128xf32>
    %193 = arith.negf %192 : vector<8x128xf32>
    %194 = math.exp %193 : vector<8x128xf32>
    %cst_45 = arith.constant 1.000000e+00 : f32
    %195 = vector.broadcast %cst_45 : f32 to vector<8x128xf32>
    %196 = arith.addf %195, %194 : vector<8x128xf32>
    %197 = arith.divf %195, %196 : vector<8x128xf32>
    %198 = vector.extract_strided_slice %188 {offsets = [0, 128], sizes = [8, 128], strides = [1, 1]} : vector<8x384xf32> to vector<8x128xf32>
    %199 = vector.extract_strided_slice %189 {offsets = [0, 128], sizes = [8, 128], strides = [1, 1]} : vector<8x384xf32> to vector<8x128xf32>
    %200 = arith.addf %198, %199 : vector<8x128xf32>
    %201 = arith.negf %200 : vector<8x128xf32>
    %202 = math.exp %201 : vector<8x128xf32>
    %cst_46 = arith.constant 1.000000e+00 : f32
    %203 = vector.broadcast %cst_46 : f32 to vector<8x128xf32>
    %204 = arith.addf %203, %202 : vector<8x128xf32>
    %205 = arith.divf %203, %204 : vector<8x128xf32>
    %206 = vector.extract_strided_slice %188 {offsets = [0, 256], sizes = [8, 128], strides = [1, 1]} : vector<8x384xf32> to vector<8x128xf32>
    %207 = vector.extract_strided_slice %189 {offsets = [0, 256], sizes = [8, 128], strides = [1, 1]} : vector<8x384xf32> to vector<8x128xf32>
    %208 = arith.addf %207, %12 : vector<8x128xf32>
    %209 = arith.mulf %197, %208 : vector<8x128xf32>
    %210 = arith.addf %206, %209 : vector<8x128xf32>
    %211 = math.tanh %210 : vector<8x128xf32>
    %cst_47 = arith.constant 1.000000e+00 : f32
    %212 = vector.broadcast %cst_47 : f32 to vector<8x128xf32>
    %213 = arith.subf %212, %205 : vector<8x128xf32>
    %214 = arith.mulf %213, %211 : vector<8x128xf32>
    %215 = arith.mulf %205, %187 : vector<8x128xf32>
    %216 = arith.addf %214, %215 : vector<8x128xf32>
    %c56 = arith.constant 56 : index
    %c0_48 = arith.constant 0 : index
    %217 = vector.load %arg8[%c56, %c0_48] : memref<64x384xf32, #tpu.memory_space<vmem>>, vector<8x384xf32>
    %cst_49 = arith.constant dense<0.000000e+00> : vector<8x384xf32>
    %218 = tpu.matmul %216, %9, %cst_49 {dimension_numbers = #tpu.dot_dimension_numbers<[1], [0], [0], [1], [0, 0, 1, 1], [], []>} : vector<8x128xf32>, vector<128x384xf32>, vector<8x384xf32> -> vector<8x384xf32>
    %219 = vector.extract_strided_slice %217 {offsets = [0, 0], sizes = [8, 128], strides = [1, 1]} : vector<8x384xf32> to vector<8x128xf32>
    %220 = vector.extract_strided_slice %218 {offsets = [0, 0], sizes = [8, 128], strides = [1, 1]} : vector<8x384xf32> to vector<8x128xf32>
    %221 = arith.addf %219, %220 : vector<8x128xf32>
    %222 = arith.negf %221 : vector<8x128xf32>
    %223 = math.exp %222 : vector<8x128xf32>
    %cst_50 = arith.constant 1.000000e+00 : f32
    %224 = vector.broadcast %cst_50 : f32 to vector<8x128xf32>
    %225 = arith.addf %224, %223 : vector<8x128xf32>
    %226 = arith.divf %224, %225 : vector<8x128xf32>
    %227 = vector.extract_strided_slice %217 {offsets = [0, 128], sizes = [8, 128], strides = [1, 1]} : vector<8x384xf32> to vector<8x128xf32>
    %228 = vector.extract_strided_slice %218 {offsets = [0, 128], sizes = [8, 128], strides = [1, 1]} : vector<8x384xf32> to vector<8x128xf32>
    %229 = arith.addf %227, %228 : vector<8x128xf32>
    %230 = arith.negf %229 : vector<8x128xf32>
    %231 = math.exp %230 : vector<8x128xf32>
    %cst_51 = arith.constant 1.000000e+00 : f32
    %232 = vector.broadcast %cst_51 : f32 to vector<8x128xf32>
    %233 = arith.addf %232, %231 : vector<8x128xf32>
    %234 = arith.divf %232, %233 : vector<8x128xf32>
    %235 = vector.extract_strided_slice %217 {offsets = [0, 256], sizes = [8, 128], strides = [1, 1]} : vector<8x384xf32> to vector<8x128xf32>
    %236 = vector.extract_strided_slice %218 {offsets = [0, 256], sizes = [8, 128], strides = [1, 1]} : vector<8x384xf32> to vector<8x128xf32>
    %237 = arith.addf %236, %12 : vector<8x128xf32>
    %238 = arith.mulf %226, %237 : vector<8x128xf32>
    %239 = arith.addf %235, %238 : vector<8x128xf32>
    %240 = math.tanh %239 : vector<8x128xf32>
    %cst_52 = arith.constant 1.000000e+00 : f32
    %241 = vector.broadcast %cst_52 : f32 to vector<8x128xf32>
    %242 = arith.subf %241, %234 : vector<8x128xf32>
    %243 = arith.mulf %242, %240 : vector<8x128xf32>
    %244 = arith.mulf %234, %216 : vector<8x128xf32>
    %245 = arith.addf %243, %244 : vector<8x128xf32>
    %c0_53 = arith.constant 0 : index
    %c0_54 = arith.constant 0 : index
    %246 = vector.load %arg5[%c0_53, %c0_54] : memref<128x128xbf16, #tpu.memory_space<vmem>>, vector<128x128xbf16>
    %247 = arith.extf %246 : vector<128x128xbf16> to vector<128x128xf32>
    %cst_55 = arith.constant dense<0.000000e+00> : vector<8x128xf32>
    %248 = tpu.matmul %245, %247, %cst_55 {dimension_numbers = #tpu.dot_dimension_numbers<[1], [0], [0], [1], [0, 0, 1, 1], [], []>} : vector<8x128xf32>, vector<128x128xf32>, vector<8x128xf32> -> vector<8x128xf32>
    %c0_56 = arith.constant 0 : index
    %c0_57 = arith.constant 0 : index
    %249 = vector.load %arg6[%c0_56, %c0_57] : memref<1x128xf32, #tpu.memory_space<vmem>>, vector<1x128xf32>
    %250 = vector.broadcast %249 : vector<1x128xf32> to vector<8x128xf32>
    %251 = arith.addf %248, %250 : vector<8x128xf32>
    %c0_58 = arith.constant 0 : index
    %c0_59 = arith.constant 0 : index
    %252 = vector.load %arg7[%c0_58, %c0_59] : memref<8x128xf32, #tpu.memory_space<vmem>>, vector<8x128xf32>
    tpu.vector_store %arg7[%c0_58, %c0_59], %251 {strides = array<i32>} : memref<8x128xf32, #tpu.memory_space<vmem>>, vector<8x128xf32>,
    return
  }
}

</mosaic_0001>

<bundles_post_ra>
// kernel: gru_value_estimator.1
= control target key start
LH: loop header
LB: loop body
LE: loop exit
PB: predicated region body
PF: predicated region fallthrough
CT: control target
= control target key end

     0   :  { %12 = vsyncpa [#allocation4], 0  ;;  %s3307_s24 = smov [#allocation3]   ;;  %s3854_s0 = inlined_call_operand.vmem [shape: f32[64,24], index: 0, kind: input, shape index: {}]   ;;  %s3855_s1 = inlined_call_operand.vmem [shape: bf16[24,384], index: 1, kind: input, shape index: {}]   ;;  %s3856_s2 = inlined_call_operand.hbm [shape: bf16[128,384], index: 2, kind: input, shape index: {}]   ;;  %s3857_s3 = inlined_call_operand.vmem [shape: f32[1,384], index: 3, kind: input, shape index: {}]   ;;  %s3858_s4 = inlined_call_operand.vmem [shape: f32[1,128], index: 4, kind: input, shape index: {}]   ;;  %s3859_s5 = inlined_call_operand.vmem [shape: bf16[128,128], index: 5, kind: input, shape index: {}]   ;;  %s3860_s6 = inlined_call_operand.vmem [shape: f32[1,128], index: 6, kind: input, shape index: {}]   ;;  %s3861_s7 = inlined_call_operand.vmem [shape: f32[8,128], index: 7, kind: output, shape index: {}]  }
   0x1   :  { %s22_s25 = sshll.u32 %s3307_s24, 4  ;;  %s3283_s28 = scalar_lea.hbm %s3856_s2, 3072  ;;  %s23_s25 = int_to_ptr.vmem [resolvable:$true] %s22_s25 }
   0x2   :  { %p3284_p0 = scmp.ne.s32.totalorder %s3856_s2, %s3283_s28  ;;  %p3287_p1 = scmp.lt.u32.totalorder %s3283_s28, %s3856_s2 }
   0x4   :  { %p3289_p2 = pnand %p3287_p1, %p3284_p0 }
   0x6   :  { %3292 = shalt.err (!%p3289_p2)
}
   0x7   :  { %s3293_s10 = scalar_lea.vmem %s23_s25, 3072  ;;  %p3298_p4 = scmp.lt.s32.totalorder %s23_s25, %s23_s25 }
   0x8   :  { %p3294_p3 = scmp.ne.s32.totalorder %s23_s25, %s3293_s10  ;;  %p3299_p5 = scmp.lt.s32.totalorder %s3293_s10, %s3293_s10 }
   0xa   :  { %p3300_p6 = por %p3299_p5, %p3298_p4 }
   0xc   :  { %p3301_p7 = pnand %p3300_p6, %p3294_p3 }
   0xe   :  { %3304 = shalt.err (!%p3301_p7)
}
   0xf   :  { %s3308_s11 = smov 192   ;;  %s3309_s12 = smov 12  }
  0x10   :  { %28 = dma.hbm_to_vmem [thread:$0]  %s3856_s2, 3072, %s23_s25, [#allocation4], %s3308_s11, %s3308_s11, %s3309_s12  }
  0x11   :  { %3305 = dma.done.wait [#allocation4], 3072  }
  0x12   :  { %3306 = vsyncadd [#allocation4], 4294964224  ;;  %v3310_v0 = vmov 0.0   ;;  %v3161_v1 = vld [vmem:[%s3855_s1 + $0x4] ss:$12 sps:$4 sm:$0xff]   ;;  %v52_v3 = vld [vmem:[%s3855_s1 + $0x18] sm:$0xff]  ;;  %v65_v42 = vlaneseq }
  0x13   :  { %169 = vmatprep.mubr.f32.mxu0 %v3310_v0  ;;  %v3163_v2 = vld [vmem:[%s3855_s1] ss:$12 sps:$4 sm:$0xff]   ;;  %vm80_vm0 = vcmask 195584   ;;  %2448 = vmatprep.subr.bf16.mxu0 %v3161_v1  ;;  %v61_v5 = vunpack.c.h.bf16 %v52_v3  ;;  %v60_v6 = vunpack.c.l.bf16 %v52_v3  ;;  %v3379_v7 = vld [vmem:[#allocation3 + $0x4] ss:$12 sps:$4 sm:$0xff]   ;;  %v43_v19 = vld [vmem:[%s3854_s0 + $0x18] sm:$0xff] }
  0x14   :  { %v40_v4 = vld [vmem:[%s3854_s0] sm:$0xff]  ;;  %2450 = vmatpush1.bf16.msra.mxu0 %v3163_v2  ;;  %v3383_v9 = vld [vmem:[#allocation3 + $0x1c] ss:$12 sps:$4 sm:$0xff]   ;;  %v42_v14 = vld [vmem:[%s3854_s0 + $0x10] sm:$0xff]  ;;  %v3311_v24 = vmov 0.0|0.0   ;;  %vm3312_vm1 = vmmov 0  }
  0x15   :  { %2120 = vmatprep.mubr.msk.f32.mxu1 %vm80_vm0, %v40_v4  ;;  %109 = vmatprep.subr.mxu0 %v61_v5  ;;  %v3381_v8 = vld [vmem:[#allocation3] ss:$12 sps:$4 sm:$0xff]   ;;  %v3392_v11 = vld [vmem:[#allocation3 + $0x18] ss:$12 sps:$4 sm:$0xff]   ;;  %v3179_v13 = vld [vmem:[%s3855_s1 + $0x8] ss:$12 sps:$4 sm:$0xff]  }
  0x16   :  { %v41_v10 = vld [vmem:[%s3854_s0 + $0x8] sm:$0xff]  ;;  %v3395_v12 = vld [vmem:[#allocation3 + $0x34] ss:$12 sps:$4 sm:$0xff]   ;;  %v3404_v15 = vld [vmem:[#allocation3 + $0x30] ss:$12 sps:$4 sm:$0xff]   ;;  %2452 = vmatprep.subr.bf16.mxu1 %v3179_v13  ;;  %v66_v43 = vshrl.u32 %v65_v42, 7 }
  0x17   :  { %v53_v16 = vld [vmem:[%s3855_s1 + $0x20] sm:$0xf]  ;;  %v3412_v17 = vld [vmem:[#allocation3 + $0x4c] ss:$12 sps:$4 sm:$0xff]   ;;  %2454 = vmatpush3.bf16.msra.mxu1 %v3179_v13  ;;  %v3420_v20 = vld [vmem:[#allocation3 + $0x48] ss:$12 sps:$4 sm:$0xff]  }
  0x18   :  { %110 = vmatpush1.msra.mxu0 %v60_v6  ;;  %v62_v18 = vunpack.c.l.bf16 %v53_v16  ;;  %v3423_v21 = vld [vmem:[#allocation3 + $0x64] ss:$12 sps:$4 sm:$0xff]   ;;  %v3425_v22 = vld [vmem:[#allocation3 + $0x8] ss:$12 sps:$4 sm:$0xff]   ;;  %v3434_v25 = vld [vmem:[#allocation3 + $0x60] ss:$12 sps:$4 sm:$0xff]  }
  0x19   :  { %1877 = vmatmul.mubr.msk.f32.vlgmr.msra.gmra.mrb[0].mxu0 %vm80_vm0, %v40_v4  ;;  %2456 = vmatprep.subr.bf16.mxu0 %v3379_v7  ;;  %v44_v23 = vld [vmem:[%s3854_s0 + $0x20] sm:$0xff]  ;;  %v3437_v26 = vld [vmem:[#allocation3 + $0x7c] ss:$12 sps:$4 sm:$0xff]   ;;  %v46_v32 = vld [vmem:[%s3854_s0 + $0x30] sm:$0xff]  ;;  %v75_v44 = vsub.s32 2, %v66_v43  ;;  %v67_v58 = vsub.s32 0, %v66_v43 }
  0x1a   :  { %2458 = vmatpush1.bf16.msra.mxu0 %v3381_v8  ;;  %175 = vmatprep.mubr.f32.mxu0 %v3310_v0  ;;  %v3441_v27 = vld [vmem:[#allocation3 + $0x20] ss:$12 sps:$4 sm:$0xff]   ;;  %v3451_v29 = vld [vmem:[#allocation3 + $0x78] ss:$12 sps:$4 sm:$0xff]   ;;  %v3468_v33 = vld [vmem:[#allocation3 + $0x90] ss:$12 sps:$4 sm:$0xff]  }
  0x1b   :  { %2460 = vmatprep.subr.bf16.mxu0 %v3383_v9  ;;  %2118 = vmatprep.subr.mxu1 %v62_v18  ;;  %v45_v28 = vld [vmem:[%s3854_s0 + $0x28] sm:$0xff]  ;;  %v3454_v30 = vld [vmem:[#allocation3 + $0x94] ss:$12 sps:$4 sm:$0xff]   ;;  %v3458_v31 = vld [vmem:[#allocation3 + $0x38] ss:$12 sps:$4 sm:$0xff]   ;;  %v71_v62 = vsub.s32 1, %v66_v43 }
  0x1c   :  { %2119 = vmatpush3.msra.mxu1 %v62_v18  ;;  %v3471_v34 = vld [vmem:[#allocation3 + $0xac] ss:$12 sps:$4 sm:$0xff]   ;;  %v3475_v35 = vld [vmem:[#allocation3 + $0x50] ss:$12 sps:$4 sm:$0xff]   ;;  %v3485_v37 = vld [vmem:[#allocation3 + $0xa8] ss:$12 sps:$4 sm:$0xff]  }
  0x1d   :  { %1878 = vmatmul.mubr.msk.f32.gmra.mrb[2].mxu0 %vm80_vm0, %v41_v10  ;;  %2487 = vmatprep.subr.bf16.mxu1 %v3311_v24  ;;  %v47_v36 = vld [vmem:[%s3854_s0 + $0x38] sm:$0xff]  ;;  %v3490_v38 = vld [vmem:[#allocation3 + $0x68] ss:$12 sps:$4 sm:$0xff]   ;;  %v3500_v39 = vld [vmem:[#allocation3 + $0x80] ss:$12 sps:$4 sm:$0xff]  }
  0x1e   :  { %2462 = vmatpush1.bf16.msra.mxu0 %v3392_v11  ;;  %181 = vmatprep.mubr.f32.mxu0 %v3310_v0  ;;  %v3508_v40 = vld [vmem:[#allocation3 + $0x98] ss:$12 sps:$4 sm:$0xff]   ;;  %v3514_v41 = vld [vmem:[#allocation3 + $0xb0] ss:$12 sps:$4 sm:$0xff]   ;;  %v63_v45 = vld [vmem:[%s3857_s3] sm:$0x7] }
  0x1f   :  { %2464 = vmatprep.subr.bf16.mxu0 %v3395_v12  ;;  %2121 = vmatmul.mubr.msk.f32.vlgmr.msra.gmra.mrb[0].mxu1 %vm80_vm0, %v41_v10  ;;  %v76_v46 = vrot.slane %v63_v45, %v75_v44  ;;  %v3567_v1 = vrot.slane %v63_v45, %v67_v58  ;;  %v3569_v3 = vrot.slane %v63_v45, %v71_v62 }
  0x20   :  { %2489 = vmatpush3.bf16.msra.mxu1 %v3425_v22  ;;  %2123 = vmatprep.mubr.msk.f32.mxu1 %vm80_vm0, %v42_v14 }
  0x21   :  { %1879 = vmatmul.mubr.msk.f32.gmra.mrb[4].mxu0 %vm80_vm0, %v42_v14  ;;  %2490 = vmatprep.subr.bf16.mxu1 %v3311_v24 }
  0x22   :  { %2466 = vmatpush1.bf16.msra.mxu0 %v3404_v15  ;;  %187 = vmatprep.mubr.f32.mxu0 %v3310_v0 }
  0x23   :  { %2468 = vmatprep.subr.bf16.mxu0 %v3412_v17  ;;  %2124 = vmatmul.mubr.msk.f32.gmra.mrb[2].mxu1 %vm80_vm0, %v43_v19 }
  0x24   :  { %2492 = vmatpush3.bf16.msra.mxu1 %v3441_v27  ;;  %2126 = vmatprep.mubr.msk.f32.mxu1 %vm80_vm0, %v44_v23 }
  0x25   :  { %1880 = vmatmul.mubr.msk.f32.gmra.mrb[6].mxu0 %vm80_vm0, %v43_v19  ;;  %2493 = vmatprep.subr.bf16.mxu1 %v3311_v24 }
  0x26   :  { %2470 = vmatpush1.bf16.msra.mxu0 %v3420_v20  ;;  %193 = vmatprep.mubr.f32.mxu0 %v3310_v0 }
  0x27   :  { %2472 = vmatprep.subr.bf16.mxu0 %v3423_v21  ;;  %2127 = vmatmul.mubr.msk.f32.gmra.mrb[4].mxu1 %vm80_vm0, %v45_v28 }
  0x28   :  { %2495 = vmatpush3.bf16.msra.mxu1 %v3458_v31  ;;  %2129 = vmatprep.mubr.msk.f32.mxu1 %vm80_vm0, %v46_v32 }
  0x29   :  { %1881 = vmatmul.mubr.msk.f32.gmra.mrb[8].mxu0 %vm80_vm0, %v44_v23  ;;  %2496 = vmatprep.subr.bf16.mxu1 %v3311_v24 }
  0x2a   :  { %2474 = vmatpush1.bf16.msra.mxu0 %v3434_v25  ;;  %199 = vmatprep.mubr.f32.mxu0 %v3310_v0 }
  0x2b   :  { %2476 = vmatprep.subr.bf16.mxu0 %v3437_v26  ;;  %2130 = vmatmul.mubr.msk.f32.gmra.mrb[6].mxu1 %vm80_vm0, %v47_v36 }
  0x2c   :  { %2498 = vmatpush3.bf16.msra.mxu1 %v3475_v35  ;;  %2164 = vmatprep.mubr.msk.f32.mxu1 %vm3312_vm1, %v3310_v0 }
  0x2d   :  { %1882 = vmatmul.mubr.msk.f32.gmra.mrb[10].mxu0 %vm80_vm0, %v45_v28  ;;  %2499 = vmatprep.subr.bf16.mxu1 %v3311_v24  ;;  %v3576_v28 = vld [vmem:[%s3858_s4] ss:$0 sm:$0xff] }
  0x2e   :  { %2478 = vmatpush1.bf16.msra.mxu0 %v3451_v29  ;;  %205 = vmatprep.mubr.f32.mxu0 %v3310_v0 }
  0x2f   :  { %2480 = vmatprep.subr.bf16.mxu0 %v3454_v30 }
  0x30   :  { %2501 = vmatpush3.bf16.msra.mxu1 %v3490_v38 }
  0x31   :  { %1883 = vmatmul.mubr.msk.f32.gmra.mrb[12].mxu0 %vm80_vm0, %v46_v32  ;;  %2502 = vmatprep.subr.bf16.mxu1 %v3311_v24 }
  0x32   :  { %2482 = vmatpush1.bf16.msra.mxu0 %v3468_v33  ;;  %211 = vmatprep.mubr.f32.mxu0 %v3310_v0 }
  0x33   :  { %2484 = vmatprep.subr.bf16.mxu0 %v3471_v34 }
  0x34   :  { %2504 = vmatpush3.bf16.msra.mxu1 %v3500_v39 }
  0x35   :  { %1884 = vmatmul.mubr.msk.f32.gmra.mrb[14].mxu0 %vm80_vm0, %v47_v36  ;;  %2505 = vmatprep.subr.bf16.mxu1 %v3311_v24 }
  0x36   :  { %2486 = vmatpush1.bf16.msra.mxu0 %v3485_v37  ;;  %501 = vmatprep.mubr.f32.mxu0 %v3310_v0 }
  0x37   :  { %2512 = vmatprep.subr.bf16.mxu0 %v3379_v7 }
  0x38   :  { %2507 = vmatpush3.bf16.msra.mxu1 %v3508_v40 }
  0x39   :  { %502 = vmatmul.mubr.f32.vlgmr.msra.gmra.mrb[0].mxu0 %v3310_v0  ;;  %2508 = vmatprep.subr.bf16.mxu1 %v3311_v24 }
  0x3a   :  { %2514 = vmatpush1.bf16.msra.mxu0 %v3381_v8  ;;  %667 = vmatprep.mubr.f32.mxu0 %v3310_v0 }
  0x3b   :  { %2516 = vmatprep.subr.bf16.mxu0 %v3383_v9 }
  0x3c   :  { %2510 = vmatpush3.bf16.msra.mxu1 %v3514_v41 }
  0x3d   :  { %2543 = vmatprep.subr.bf16.mxu1 %v3311_v24 }
  0x3e   :  { %2518 = vmatpush1.bf16.msra.mxu0 %v3392_v11 }
  0x3f   :  { %2520 = vmatprep.subr.bf16.mxu0 %v3395_v12  ;;  %2165 = vmatmul.mubr.f32.vlgmr.msra.gmra.mrb[8].mxu1 %v3310_v0 }
  0x40   :  { %2545 = vmatpush3.bf16.msra.mxu1 %v3425_v22  ;;  %2199 = vmatprep.mubr.msk.f32.mxu1 %vm3312_vm1, %v3310_v0 }
  0x41   :  { %2546 = vmatprep.subr.bf16.mxu1 %v3311_v24 }
  0x42   :  { %2522 = vmatpush1.bf16.msra.mxu0 %v3404_v15 }
  0x43   :  { %2524 = vmatprep.subr.bf16.mxu0 %v3412_v17 }
  0x44   :  { %2548 = vmatpush3.bf16.msra.mxu1 %v3441_v27 }
  0x45   :  { %2549 = vmatprep.subr.bf16.mxu1 %v3311_v24 }
  0x46   :  { %2526 = vmatpush1.bf16.msra.mxu0 %v3420_v20 }
  0x47   :  { %2528 = vmatprep.subr.bf16.mxu0 %v3423_v21 }
  0x48   :  { %2551 = vmatpush3.bf16.msra.mxu1 %v3458_v31 }
  0x49   :  { %2552 = vmatprep.subr.bf16.mxu1 %v3311_v24 }
  0x4a   :  { %2530 = vmatpush1.bf16.msra.mxu0 %v3434_v25 }
  0x4b   :  { %2532 = vmatprep.subr.bf16.mxu0 %v3437_v26 }
  0x4c   :  { %2554 = vmatpush3.bf16.msra.mxu1 %v3475_v35 }
  0x4d   :  { %2555 = vmatprep.subr.bf16.mxu1 %v3311_v24 }
  0x4e   :  { %2534 = vmatpush1.bf16.msra.mxu0 %v3451_v29 }
  0x4f   :  { %2536 = vmatprep.subr.bf16.mxu0 %v3454_v30 }
  0x50   :  { %2557 = vmatpush3.bf16.msra.mxu1 %v3490_v38 }
  0x51   :  { %2558 = vmatprep.subr.bf16.mxu1 %v3311_v24 }
  0x52   :  { %2538 = vmatpush1.bf16.msra.mxu0 %v3468_v33 }
  0x53   :  { %2540 = vmatprep.subr.bf16.mxu0 %v3471_v34 }
  0x54   :  { %2560 = vmatpush3.bf16.msra.mxu1 %v3500_v39 }
  0x55   :  { %2561 = vmatprep.subr.bf16.mxu1 %v3311_v24 }
  0x56   :  { %2542 = vmatpush1.bf16.msra.mxu0 %v3485_v37 }
  0x57   :  { %2568 = vmatprep.subr.bf16.mxu0 %v3379_v7 }
  0x58   :  { %2563 = vmatpush3.bf16.msra.mxu1 %v3508_v40 }
  0x59   :  { %2564 = vmatprep.subr.bf16.mxu1 %v3311_v24 }
  0x5c   :  { %2566 = vmatpush3.bf16.msra.mxu1 %v3514_v41 }
  0x5d   :  { %2599 = vmatprep.subr.bf16.mxu1 %v3311_v24 }
  0xf2   :  { %v2122_v47 = vpop.f32.mrb[0].mxu1 }
  0xf3   :  { %v3553_v48 = vadd.f32 %v2122_v47, %v76_v46  ;;  %v284_v49 = vpop.f32.mrb[1].mxu1 }
  0xf4   :  { %v285_v43 = vadd.f32 %v284_v49, %v76_v46 }
  0xf6   :  { %v2125_v50 = vpop.f32.mrb[2].mxu1 }
  0xf7   :  { %v3555_v51 = vadd.f32 %v2125_v50, %v76_v46  ;;  %v294_v52 = vpop.f32.mrb[3].mxu1 }
  0xf8   :  { %v3557_v53 = vadd.f32 %v294_v52, %v76_v46 }
  0xfa   :  { %v2128_v54 = vpop.f32.mrb[4].mxu1 }
  0xfb   :  { %v3559_v55 = vadd.f32 %v2128_v54, %v76_v46  ;;  %v304_v56 = vpop.f32.mrb[5].mxu1 }
  0xfc   :  { %v3561_v57 = vadd.f32 %v304_v56, %v76_v46 }
  0xfe   :  { %v2131_v59 = vpop.f32.mrb[6].mxu1 }
  0xff   :  { %v3563_v60 = vadd.f32 %v2131_v59, %v76_v46  ;;  %v314_v61 = vpop.f32.mrb[7].mxu1 }
 0x100   :  { %v3565_v63 = vadd.f32 %v314_v61, %v76_v46 }
 0x10c   :  { %v503_v2 = vpop.f32.mrb[0].mxu0 }
 0x10d   :  { %v2927_v4 = vadd.f32 %v503_v2, %v3567_v1  ;;  %v505_v5 = vpop.f32.mrb[1].mxu0 }
 0x10e   :  { %v2928_v10 = vadd.f32 %v505_v5, %v3569_v3 }
 0x10f   :  { %v1894_v6 = vmul.f32 -1.442695, %v2927_v4 }
 0x110   :  { %v1895_v13 = vmul.f32 -1.442695, %v2928_v10 }
 0x111   :  { %3197 = vpow2.f32 %v1894_v6 }
 0x112   :  { %3199 = vpow2.f32 %v1895_v13  ;;  %v574_v14 = vpop.f32.mrb[8].mxu1 }
 0x113   :  { %v2166_v18 = vpop.f32.mrb[9].mxu1  ;;  %v592_v36 = vadd.f32 %v3576_v28, %v574_v14 }
 0x11b   :  { %v3198_v16 = vpop.eup %3197 }
 0x11c   :  { %v582_v19 = vadd.f32 1.0, %v3198_v16  ;;  %v3200_v23 = vpop.eup %3199 }
 0x11d   :  { %v589_v32 = vadd.f32 1.0, %v3200_v23 }
 0x11e   :  { %3201 = vrcp.f32 %v582_v19 }
 0x11f   :  { %3203 = vrcp.f32 %v589_v32 }
 0x128   :  { %v3202_v42 = vpop.eup %3201 }
 0x129   :  { %v593_v44 = vmul.f32 %v3202_v42, %v592_v36  ;;  %v3204_v47 = vpop.eup %3203 }
 0x12a   :  { %v596_v50 = vsub.f32 1.0, %v3204_v47  ;;  %v598_v56 = vmul.f32 0.0, %v3204_v47 }
 0x12b   :  { %v594_v45 = vadd.f32 %v593_v44, %v285_v43 }
 0x12d   :  { %3205 = vtanh.f32 %v594_v45 }
 0x137   :  { %v3206_v52 = vpop.eup %3205 }
 0x138   :  { %v597_v54 = vmul.f32 %v3206_v52, %v596_v50 }
 0x13a   :  { %v599_v58 = vadd.f32 %v598_v56, %v597_v54 }
 0x13c   :  { %668 = vmatmul.mubr.f32.vlgmr.msra.gmra.mrb[2].mxu0 %v599_v58  ;;  %2200 = vmatmul.mubr.f32.vlgmr.msra.gmra.mrb[10].mxu1 %v599_v58 }
 0x13d   :  { %2570 = vmatpush1.bf16.msra.mxu0 %v3381_v8  ;;  %2601 = vmatpush3.bf16.msra.mxu1 %v3425_v22 }
 0x13e   :  { %2572 = vmatprep.subr.bf16.mxu0 %v3383_v9  ;;  %2602 = vmatprep.subr.bf16.mxu1 %v3311_v24 }
 0x13f   :  { %833 = vmatprep.mubr.f32.mxu0 %v3310_v0  ;;  %2234 = vmatprep.mubr.msk.f32.mxu1 %vm3312_vm1, %v3310_v0 }
 0x141   :  { %2574 = vmatpush1.bf16.msra.mxu0 %v3392_v11  ;;  %2604 = vmatpush3.bf16.msra.mxu1 %v3441_v27 }
 0x142   :  { %2576 = vmatprep.subr.bf16.mxu0 %v3395_v12  ;;  %2605 = vmatprep.subr.bf16.mxu1 %v3311_v24 }
 0x145   :  { %2578 = vmatpush1.bf16.msra.mxu0 %v3404_v15  ;;  %2607 = vmatpush3.bf16.msra.mxu1 %v3458_v31 }
 0x146   :  { %2580 = vmatprep.subr.bf16.mxu0 %v3412_v17  ;;  %2608 = vmatprep.subr.bf16.mxu1 %v3311_v24 }
 0x149   :  { %2582 = vmatpush1.bf16.msra.mxu0 %v3420_v20  ;;  %2610 = vmatpush3.bf16.msra.mxu1 %v3475_v35 }
 0x14a   :  { %2584 = vmatprep.subr.bf16.mxu0 %v3423_v21  ;;  %2611 = vmatprep.subr.bf16.mxu1 %v3311_v24 }
 0x14d   :  { %2586 = vmatpush1.bf16.msra.mxu0 %v3434_v25  ;;  %2613 = vmatpush3.bf16.msra.mxu1 %v3490_v38 }
 0x14e   :  { %2588 = vmatprep.subr.bf16.mxu0 %v3437_v26  ;;  %2614 = vmatprep.subr.bf16.mxu1 %v3311_v24 }
 0x151   :  { %2590 = vmatpush1.bf16.msra.mxu0 %v3451_v29  ;;  %2616 = vmatpush3.bf16.msra.mxu1 %v3500_v39 }
 0x152   :  { %2592 = vmatprep.subr.bf16.mxu0 %v3454_v30  ;;  %2617 = vmatprep.subr.bf16.mxu1 %v3311_v24 }
 0x155   :  { %2594 = vmatpush1.bf16.msra.mxu0 %v3468_v33  ;;  %2619 = vmatpush3.bf16.msra.mxu1 %v3508_v40 }
 0x156   :  { %2596 = vmatprep.subr.bf16.mxu0 %v3471_v34  ;;  %2620 = vmatprep.subr.bf16.mxu1 %v3311_v24 }
 0x159   :  { %2598 = vmatpush1.bf16.msra.mxu0 %v3485_v37  ;;  %2622 = vmatpush3.bf16.msra.mxu1 %v3514_v41 }
 0x15a   :  { %2624 = vmatprep.subr.bf16.mxu0 %v3379_v7  ;;  %2655 = vmatprep.subr.bf16.mxu1 %v3311_v24 }
 0x20f   :  { %v669_v46 = vpop.f32.mrb[2].mxu0  ;;  %v740_v49 = vpop.f32.mrb[10].mxu1 }
 0x210   :  { %v2929_v59 = vadd.f32 %v669_v46, %v3567_v1  ;;  %v671_v61 = vpop.f32.mrb[3].mxu0  ;;  %v2201_v62 = vpop.f32.mrb[11].mxu1  ;;  %v758_v16 = vadd.f32 %v3576_v28, %v740_v49 }
 0x211   :  { %v2930_v4 = vadd.f32 %v671_v61, %v3569_v3 }
 0x212   :  { %v1896_v2 = vmul.f32 -1.442695, %v2929_v59 }
 0x213   :  { %v1897_v5 = vmul.f32 -1.442695, %v2930_v4 }
 0x214   :  { %3207 = vpow2.f32 %v1896_v2 }
 0x215   :  { %3209 = vpow2.f32 %v1897_v5 }
 0x21e   :  { %v3208_v6 = vpop.eup %3207 }
 0x21f   :  { %v748_v10 = vadd.f32 1.0, %v3208_v6  ;;  %v3210_v13 = vpop.eup %3209 }
 0x220   :  { %v755_v14 = vadd.f32 1.0, %v3210_v13 }
 0x221   :  { %3211 = vrcp.f32 %v748_v10 }
 0x222   :  { %3213 = vrcp.f32 %v755_v14 }
 0x22b   :  { %v3212_v18 = vpop.eup %3211 }
 0x22c   :  { %v759_v19 = vmul.f32 %v3212_v18, %v758_v16  ;;  %v3214_v32 = vpop.eup %3213 }
 0x22d   :  { %v762_v36 = vsub.f32 1.0, %v3214_v32  ;;  %v764_v44 = vmul.f32 %v3214_v32, %v599_v58 }
 0x22e   :  { %v760_v23 = vadd.f32 %v759_v19, %v3553_v48 }
 0x230   :  { %3215 = vtanh.f32 %v760_v23 }
 0x23a   :  { %v3216_v42 = vpop.eup %3215 }
 0x23b   :  { %v763_v43 = vmul.f32 %v3216_v42, %v762_v36 }
 0x23d   :  { %v765_v45 = vadd.f32 %v764_v44, %v763_v43 }
 0x23f   :  { %834 = vmatmul.mubr.f32.vlgmr.msra.gmra.mrb[4].mxu0 %v765_v45  ;;  %2235 = vmatmul.mubr.f32.vlgmr.msra.gmra.mrb[12].mxu1 %v765_v45 }
 0x240   :  { %2626 = vmatpush1.bf16.msra.mxu0 %v3381_v8  ;;  %2657 = vmatpush3.bf16.msra.mxu1 %v3425_v22 }
 0x241   :  { %2628 = vmatprep.subr.bf16.mxu0 %v3383_v9  ;;  %2658 = vmatprep.subr.bf16.mxu1 %v3311_v24 }
 0x242   :  { %999 = vmatprep.mubr.f32.mxu0 %v3310_v0  ;;  %2269 = vmatprep.mubr.msk.f32.mxu1 %vm3312_vm1, %v3310_v0 }
 0x244   :  { %2630 = vmatpush1.bf16.msra.mxu0 %v3392_v11  ;;  %2660 = vmatpush3.bf16.msra.mxu1 %v3441_v27 }
 0x245   :  { %2632 = vmatprep.subr.bf16.mxu0 %v3395_v12  ;;  %2661 = vmatprep.subr.bf16.mxu1 %v3311_v24 }
 0x248   :  { %2634 = vmatpush1.bf16.msra.mxu0 %v3404_v15  ;;  %2663 = vmatpush3.bf16.msra.mxu1 %v3458_v31 }
 0x249   :  { %2636 = vmatprep.subr.bf16.mxu0 %v3412_v17  ;;  %2664 = vmatprep.subr.bf16.mxu1 %v3311_v24 }
 0x24c   :  { %2638 = vmatpush1.bf16.msra.mxu0 %v3420_v20  ;;  %2666 = vmatpush3.bf16.msra.mxu1 %v3475_v35 }
 0x24d   :  { %2640 = vmatprep.subr.bf16.mxu0 %v3423_v21  ;;  %2667 = vmatprep.subr.bf16.mxu1 %v3311_v24 }
 0x250   :  { %2642 = vmatpush1.bf16.msra.mxu0 %v3434_v25  ;;  %2669 = vmatpush3.bf16.msra.mxu1 %v3490_v38 }
 0x251   :  { %2644 = vmatprep.subr.bf16.mxu0 %v3437_v26  ;;  %2670 = vmatprep.subr.bf16.mxu1 %v3311_v24 }
 0x254   :  { %2646 = vmatpush1.bf16.msra.mxu0 %v3451_v29  ;;  %2672 = vmatpush3.bf16.msra.mxu1 %v3500_v39 }
 0x255   :  { %2648 = vmatprep.subr.bf16.mxu0 %v3454_v30  ;;  %2673 = vmatprep.subr.bf16.mxu1 %v3311_v24 }
 0x258   :  { %2650 = vmatpush1.bf16.msra.mxu0 %v3468_v33  ;;  %2675 = vmatpush3.bf16.msra.mxu1 %v3508_v40 }
 0x259   :  { %2652 = vmatprep.subr.bf16.mxu0 %v3471_v34  ;;  %2676 = vmatprep.subr.bf16.mxu1 %v3311_v24 }
 0x25c   :  { %2654 = vmatpush1.bf16.msra.mxu0 %v3485_v37  ;;  %2678 = vmatpush3.bf16.msra.mxu1 %v3514_v41 }
 0x25d   :  { %2680 = vmatprep.subr.bf16.mxu0 %v3379_v7  ;;  %2711 = vmatprep.subr.bf16.mxu1 %v3311_v24 }
 0x312   :  { %v835_v48 = vpop.f32.mrb[4].mxu0  ;;  %v906_v47 = vpop.f32.mrb[12].mxu1 }
 0x313   :  { %v2931_v50 = vadd.f32 %v835_v48, %v3567_v1  ;;  %v837_v52 = vpop.f32.mrb[5].mxu0  ;;  %v2236_v54 = vpop.f32.mrb[13].mxu1  ;;  %v924_v2 = vadd.f32 %v3576_v28, %v906_v47 }
 0x314   :  { %v2932_v58 = vadd.f32 %v837_v52, %v3569_v3 }
 0x315   :  { %v1898_v56 = vmul.f32 -1.442695, %v2931_v50 }
 0x316   :  { %v1899_v46 = vmul.f32 -1.442695, %v2932_v58 }
 0x317   :  { %3217 = vpow2.f32 %v1898_v56 }
 0x318   :  { %3219 = vpow2.f32 %v1899_v46 }
 0x321   :  { %v3218_v49 = vpop.eup %3217 }
 0x322   :  { %v914_v59 = vadd.f32 1.0, %v3218_v49  ;;  %v3220_v61 = vpop.eup %3219 }
 0x323   :  { %v921_v62 = vadd.f32 1.0, %v3220_v61 }
 0x324   :  { %3221 = vrcp.f32 %v914_v59 }
 0x325   :  { %3223 = vrcp.f32 %v921_v62 }
 0x32e   :  { %v3222_v4 = vpop.eup %3221 }
 0x32f   :  { %v925_v5 = vmul.f32 %v3222_v4, %v924_v2  ;;  %v3224_v10 = vpop.eup %3223 }
 0x330   :  { %v928_v13 = vsub.f32 1.0, %v3224_v10  ;;  %v930_v18 = vmul.f32 %v3224_v10, %v765_v45 }
 0x331   :  { %v926_v6 = vadd.f32 %v925_v5, %v3557_v53 }
 0x333   :  { %3225 = vtanh.f32 %v926_v6 }
 0x33d   :  { %v3226_v14 = vpop.eup %3225 }
 0x33e   :  { %v929_v16 = vmul.f32 %v3226_v14, %v928_v13 }
 0x340   :  { %v931_v19 = vadd.f32 %v930_v18, %v929_v16 }
 0x342   :  { %1000 = vmatmul.mubr.f32.vlgmr.msra.gmra.mrb[6].mxu0 %v931_v19  ;;  %2270 = vmatmul.mubr.f32.vlgmr.msra.gmra.mrb[14].mxu1 %v931_v19 }
 0x343   :  { %2682 = vmatpush1.bf16.msra.mxu0 %v3381_v8  ;;  %2713 = vmatpush3.bf16.msra.mxu1 %v3425_v22 }
 0x344   :  { %2684 = vmatprep.subr.bf16.mxu0 %v3383_v9  ;;  %2714 = vmatprep.subr.bf16.mxu1 %v3311_v24 }
 0x345   :  { %1165 = vmatprep.mubr.f32.mxu0 %v3310_v0  ;;  %2304 = vmatprep.mubr.msk.f32.mxu1 %vm3312_vm1, %v3310_v0 }
 0x347   :  { %2686 = vmatpush1.bf16.msra.mxu0 %v3392_v11  ;;  %2716 = vmatpush3.bf16.msra.mxu1 %v3441_v27 }
 0x348   :  { %2688 = vmatprep.subr.bf16.mxu0 %v3395_v12  ;;  %2717 = vmatprep.subr.bf16.mxu1 %v3311_v24 }
 0x34b   :  { %2690 = vmatpush1.bf16.msra.mxu0 %v3404_v15  ;;  %2719 = vmatpush3.bf16.msra.mxu1 %v3458_v31 }
 0x34c   :  { %2692 = vmatprep.subr.bf16.mxu0 %v3412_v17  ;;  %2720 = vmatprep.subr.bf16.mxu1 %v3311_v24 }
 0x34f   :  { %2694 = vmatpush1.bf16.msra.mxu0 %v3420_v20  ;;  %2722 = vmatpush3.bf16.msra.mxu1 %v3475_v35 }
 0x350   :  { %2696 = vmatprep.subr.bf16.mxu0 %v3423_v21  ;;  %2723 = vmatprep.subr.bf16.mxu1 %v3311_v24 }
 0x353   :  { %2698 = vmatpush1.bf16.msra.mxu0 %v3434_v25  ;;  %2725 = vmatpush3.bf16.msra.mxu1 %v3490_v38 }
 0x354   :  { %2700 = vmatprep.subr.bf16.mxu0 %v3437_v26  ;;  %2726 = vmatprep.subr.bf16.mxu1 %v3311_v24 }
 0x357   :  { %2702 = vmatpush1.bf16.msra.mxu0 %v3451_v29  ;;  %2728 = vmatpush3.bf16.msra.mxu1 %v3500_v39 }
 0x358   :  { %2704 = vmatprep.subr.bf16.mxu0 %v3454_v30  ;;  %2729 = vmatprep.subr.bf16.mxu1 %v3311_v24 }
 0x35b   :  { %2706 = vmatpush1.bf16.msra.mxu0 %v3468_v33  ;;  %2731 = vmatpush3.bf16.msra.mxu1 %v3508_v40 }
 0x35c   :  { %2708 = vmatprep.subr.bf16.mxu0 %v3471_v34  ;;  %2732 = vmatprep.subr.bf16.mxu1 %v3311_v24 }
 0x35f   :  { %2710 = vmatpush1.bf16.msra.mxu0 %v3485_v37  ;;  %2734 = vmatpush3.bf16.msra.mxu1 %v3514_v41 }
 0x360   :  { %2736 = vmatprep.subr.bf16.mxu0 %v3379_v7  ;;  %2767 = vmatprep.subr.bf16.mxu1 %v3311_v24 }
 0x415   :  { %v1001_v53 = vpop.f32.mrb[6].mxu0  ;;  %v1072_v23 = vpop.f32.mrb[14].mxu1 }
 0x416   :  { %v2933_v32 = vadd.f32 %v1001_v53, %v3567_v1  ;;  %v1003_v36 = vpop.f32.mrb[7].mxu0  ;;  %v2271_v42 = vpop.f32.mrb[15].mxu1  ;;  %v1090_v54 = vadd.f32 %v3576_v28, %v1072_v23 }
 0x417   :  { %v2934_v44 = vadd.f32 %v1003_v36, %v3569_v3 }
 0x418   :  { %v1900_v43 = vmul.f32 -1.442695, %v2933_v32 }
 0x419   :  { %v1901_v45 = vmul.f32 -1.442695, %v2934_v44 }
 0x41a   :  { %3227 = vpow2.f32 %v1900_v43 }
 0x41b   :  { %3229 = vpow2.f32 %v1901_v45 }
 0x424   :  { %v3228_v48 = vpop.eup %3227 }
 0x425   :  { %v1080_v47 = vadd.f32 1.0, %v3228_v48  ;;  %v3230_v50 = vpop.eup %3229 }
 0x426   :  { %v1087_v52 = vadd.f32 1.0, %v3230_v50 }
 0x427   :  { %3231 = vrcp.f32 %v1080_v47 }
 0x428   :  { %3233 = vrcp.f32 %v1087_v52 }
 0x431   :  { %v3232_v56 = vpop.eup %3231 }
 0x432   :  { %v1091_v58 = vmul.f32 %v3232_v56, %v1090_v54  ;;  %v3234_v49 = vpop.eup %3233 }
 0x433   :  { %v1094_v59 = vsub.f32 1.0, %v3234_v49  ;;  %v1096_v2 = vmul.f32 %v3234_v49, %v931_v19 }
 0x434   :  { %v1092_v46 = vadd.f32 %v1091_v58, %v3555_v51 }
 0x436   :  { %3235 = vtanh.f32 %v1092_v46 }
 0x440   :  { %v3236_v61 = vpop.eup %3235 }
 0x441   :  { %v1095_v62 = vmul.f32 %v3236_v61, %v1094_v59 }
 0x443   :  { %v1097_v4 = vadd.f32 %v1096_v2, %v1095_v62 }
 0x445   :  { %1166 = vmatmul.mubr.f32.vlgmr.msra.gmra.mrb[8].mxu0 %v1097_v4  ;;  %2305 = vmatmul.mubr.f32.vlgmr.msra.gmra.mrb[16].mxu1 %v1097_v4 }
 0x446   :  { %2738 = vmatpush1.bf16.msra.mxu0 %v3381_v8  ;;  %2769 = vmatpush3.bf16.msra.mxu1 %v3425_v22 }
 0x447   :  { %2740 = vmatprep.subr.bf16.mxu0 %v3383_v9  ;;  %2770 = vmatprep.subr.bf16.mxu1 %v3311_v24 }
 0x448   :  { %1331 = vmatprep.mubr.f32.mxu0 %v3310_v0  ;;  %2339 = vmatprep.mubr.msk.f32.mxu1 %vm3312_vm1, %v3310_v0 }
 0x44a   :  { %2742 = vmatpush1.bf16.msra.mxu0 %v3392_v11  ;;  %2772 = vmatpush3.bf16.msra.mxu1 %v3441_v27 }
 0x44b   :  { %2744 = vmatprep.subr.bf16.mxu0 %v3395_v12  ;;  %2773 = vmatprep.subr.bf16.mxu1 %v3311_v24 }
 0x44e   :  { %2746 = vmatpush1.bf16.msra.mxu0 %v3404_v15  ;;  %2775 = vmatpush3.bf16.msra.mxu1 %v3458_v31 }
 0x44f   :  { %2748 = vmatprep.subr.bf16.mxu0 %v3412_v17  ;;  %2776 = vmatprep.subr.bf16.mxu1 %v3311_v24 }
 0x452   :  { %2750 = vmatpush1.bf16.msra.mxu0 %v3420_v20  ;;  %2778 = vmatpush3.bf16.msra.mxu1 %v3475_v35 }
 0x453   :  { %2752 = vmatprep.subr.bf16.mxu0 %v3423_v21  ;;  %2779 = vmatprep.subr.bf16.mxu1 %v3311_v24 }
 0x456   :  { %2754 = vmatpush1.bf16.msra.mxu0 %v3434_v25  ;;  %2781 = vmatpush3.bf16.msra.mxu1 %v3490_v38 }
 0x457   :  { %2756 = vmatprep.subr.bf16.mxu0 %v3437_v26  ;;  %2782 = vmatprep.subr.bf16.mxu1 %v3311_v24 }
 0x45a   :  { %2758 = vmatpush1.bf16.msra.mxu0 %v3451_v29  ;;  %2784 = vmatpush3.bf16.msra.mxu1 %v3500_v39 }
 0x45b   :  { %2760 = vmatprep.subr.bf16.mxu0 %v3454_v30  ;;  %2785 = vmatprep.subr.bf16.mxu1 %v3311_v24 }
 0x45e   :  { %2762 = vmatpush1.bf16.msra.mxu0 %v3468_v33  ;;  %2787 = vmatpush3.bf16.msra.mxu1 %v3508_v40 }
 0x45f   :  { %2764 = vmatprep.subr.bf16.mxu0 %v3471_v34  ;;  %2788 = vmatprep.subr.bf16.mxu1 %v3311_v24 }
 0x462   :  { %2766 = vmatpush1.bf16.msra.mxu0 %v3485_v37  ;;  %2790 = vmatpush3.bf16.msra.mxu1 %v3514_v41 }
 0x463   :  { %2792 = vmatprep.subr.bf16.mxu0 %v3379_v7  ;;  %2823 = vmatprep.subr.bf16.mxu1 %v3311_v24 }
 0x518   :  { %v1167_v51 = vpop.f32.mrb[8].mxu0  ;;  %v1238_v5 = vpop.f32.mrb[16].mxu1 }
 0x519   :  { %v2935_v6 = vadd.f32 %v1167_v51, %v3567_v1  ;;  %v1169_v10 = vpop.f32.mrb[9].mxu0  ;;  %v2306_v13 = vpop.f32.mrb[17].mxu1  ;;  %v1256_v36 = vadd.f32 %v3576_v28, %v1238_v5 }
 0x51a   :  { %v2936_v16 = vadd.f32 %v1169_v10, %v3569_v3 }
 0x51b   :  { %v1902_v14 = vmul.f32 -1.442695, %v2935_v6 }
 0x51c   :  { %v1903_v18 = vmul.f32 -1.442695, %v2936_v16  ;;  %v3278_v16 = vld [vmem:[#allocation3 + $0x1c] ss:$12 sps:$4 sm:$0xff]  }
 0x51d   :  { %3237 = vpow2.f32 %v1902_v14  ;;  %v3277_v14 = vld [vmem:[#allocation3] ss:$12 sps:$4 sm:$0xff]  }
 0x51e   :  { %3239 = vpow2.f32 %v1903_v18  ;;  %v3280_v18 = vld [vmem:[#allocation3 + $0x34] ss:$12 sps:$4 sm:$0xff]  }
 0x527   :  { %v3238_v19 = vpop.eup %3237 }
 0x528   :  { %v1246_v53 = vadd.f32 1.0, %v3238_v19  ;;  %v3240_v23 = vpop.eup %3239  ;;  %v3281_v19 = vld [vmem:[#allocation3 + $0x30] ss:$12 sps:$4 sm:$0xff]  }
 0x529   :  { %v1253_v32 = vadd.f32 1.0, %v3240_v23 }
 0x52a   :  { %3241 = vrcp.f32 %v1246_v53 }
 0x52b   :  { %3243 = vrcp.f32 %v1253_v32 }
 0x534   :  { %v3242_v42 = vpop.eup %3241 }
 0x535   :  { %v1257_v43 = vmul.f32 %v3242_v42, %v1256_v36  ;;  %v3244_v45 = vpop.eup %3243 }
 0x536   :  { %v1260_v48 = vsub.f32 1.0, %v3244_v45  ;;  %v1262_v52 = vmul.f32 %v3244_v45, %v1097_v4  ;;  %v1944_v45 = vld [vmem:[%s3859_s5 + $0x10] sm:$0xff]  }
 0x537   :  { %v1258_v44 = vadd.f32 %v1257_v43, %v3561_v57 }
 0x539   :  { %3245 = vtanh.f32 %v1258_v44  ;;  %v1912_v44 = vld [vmem:[%s3859_s5] sm:$0xff]  }
 0x543   :  { %v3246_v47 = vpop.eup %3245 }
 0x544   :  { %v1261_v50 = vmul.f32 %v3246_v47, %v1260_v48  ;;  %v1946_v48 = vld [vmem:[%s3859_s5 + $0x20] sm:$0xff]   ;;  %v1947_v47 = vld [vmem:[%s3859_s5 + $0x28] sm:$0xff]  }
 0x546   :  { %v1263_v54 = vadd.f32 %v1262_v52, %v1261_v50  ;;  %v1948_v50 = vld [vmem:[%s3859_s5 + $0x30] sm:$0xff]   ;;  %v1949_v52 = vld [vmem:[%s3859_s5 + $0x38] sm:$0xff]  }
 0x548   :  { %1332 = vmatmul.mubr.f32.vlgmr.msra.gmra.mrb[10].mxu0 %v1263_v54  ;;  %2340 = vmatmul.mubr.f32.vlgmr.msra.gmra.mrb[18].mxu1 %v1263_v54 }
 0x549   :  { %2794 = vmatpush1.bf16.msra.mxu0 %v3381_v8  ;;  %2825 = vmatpush3.bf16.msra.mxu1 %v3425_v22 }
 0x54a   :  { %2796 = vmatprep.subr.bf16.mxu0 %v3383_v9  ;;  %2826 = vmatprep.subr.bf16.mxu1 %v3311_v24 }
 0x54b   :  { %1497 = vmatprep.mubr.f32.mxu0 %v3310_v0  ;;  %2374 = vmatprep.mubr.msk.f32.mxu1 %vm3312_vm1, %v3310_v0 }
 0x54d   :  { %2798 = vmatpush1.bf16.msra.mxu0 %v3392_v11  ;;  %2828 = vmatpush3.bf16.msra.mxu1 %v3441_v27 }
 0x54e   :  { %2800 = vmatprep.subr.bf16.mxu0 %v3395_v12  ;;  %2829 = vmatprep.subr.bf16.mxu1 %v3311_v24 }
 0x551   :  { %2802 = vmatpush1.bf16.msra.mxu0 %v3404_v15  ;;  %2831 = vmatpush3.bf16.msra.mxu1 %v3458_v31 }
 0x552   :  { %2804 = vmatprep.subr.bf16.mxu0 %v3412_v17  ;;  %2832 = vmatprep.subr.bf16.mxu1 %v3311_v24 }
 0x555   :  { %2806 = vmatpush1.bf16.msra.mxu0 %v3420_v20  ;;  %2834 = vmatpush3.bf16.msra.mxu1 %v3475_v35 }
 0x556   :  { %2808 = vmatprep.subr.bf16.mxu0 %v3423_v21  ;;  %2835 = vmatprep.subr.bf16.mxu1 %v3311_v24 }
 0x559   :  { %2810 = vmatpush1.bf16.msra.mxu0 %v3434_v25  ;;  %2837 = vmatpush3.bf16.msra.mxu1 %v3490_v38 }
 0x55a   :  { %2812 = vmatprep.subr.bf16.mxu0 %v3437_v26  ;;  %2838 = vmatprep.subr.bf16.mxu1 %v3311_v24 }
 0x55d   :  { %2814 = vmatpush1.bf16.msra.mxu0 %v3451_v29  ;;  %2840 = vmatpush3.bf16.msra.mxu1 %v3500_v39 }
 0x55e   :  { %2816 = vmatprep.subr.bf16.mxu0 %v3454_v30  ;;  %2841 = vmatprep.subr.bf16.mxu1 %v3311_v24 }
 0x561   :  { %2818 = vmatpush1.bf16.msra.mxu0 %v3468_v33  ;;  %2843 = vmatpush3.bf16.msra.mxu1 %v3508_v40 }
 0x562   :  { %2820 = vmatprep.subr.bf16.mxu0 %v3471_v34  ;;  %2844 = vmatprep.subr.bf16.mxu1 %v3311_v24 }
 0x565   :  { %2822 = vmatpush1.bf16.msra.mxu0 %v3485_v37  ;;  %2846 = vmatpush3.bf16.msra.mxu1 %v3514_v41 }
 0x566   :  { %2848 = vmatprep.subr.bf16.mxu0 %v3379_v7  ;;  %2879 = vmatprep.subr.bf16.mxu1 %v3311_v24 }
 0x61b   :  { %v1333_v8 = vpop.f32.mrb[10].mxu0  ;;  %v1404_v9 = vpop.f32.mrb[18].mxu1 }
 0x61c   :  { %v2937_v11 = vadd.f32 %v1333_v8, %v3567_v1  ;;  %v1335_v12 = vpop.f32.mrb[11].mxu0  ;;  %v2341_v15 = vpop.f32.mrb[19].mxu1  ;;  %v1422_v7 = vadd.f32 %v3576_v28, %v1404_v9 }
 0x61d   :  { %v2938_v57 = vadd.f32 %v1335_v12, %v3569_v3 }
 0x61e   :  { %v1904_v17 = vmul.f32 -1.442695, %v2937_v11 }
 0x61f   :  { %v1905_v56 = vmul.f32 -1.442695, %v2938_v57 }
 0x620   :  { %3247 = vpow2.f32 %v1904_v17 }
 0x621   :  { %3249 = vpow2.f32 %v1905_v56 }
 0x62a   :  { %v3248_v58 = vpop.eup %3247 }
 0x62b   :  { %v1412_v46 = vadd.f32 1.0, %v3248_v58  ;;  %v3250_v49 = vpop.eup %3249 }
 0x62c   :  { %v1419_v59 = vadd.f32 1.0, %v3250_v49 }
 0x62d   :  { %3251 = vrcp.f32 %v1412_v46 }
 0x62e   :  { %3253 = vrcp.f32 %v1419_v59 }
 0x637   :  { %v3252_v61 = vpop.eup %3251 }
 0x638   :  { %v1423_v62 = vmul.f32 %v3252_v61, %v1422_v7  ;;  %v3254_v4 = vpop.eup %3253 }
 0x639   :  { %v1426_v51 = vsub.f32 1.0, %v3254_v4  ;;  %v1428_v10 = vmul.f32 %v3254_v4, %v1263_v54 }
 0x63a   :  { %v1424_v2 = vadd.f32 %v1423_v62, %v3559_v55  ;;  %v3279_v55 = vld [vmem:[#allocation3 + $0x18] ss:$12 sps:$4 sm:$0xff]  }
 0x63c   :  { %3255 = vtanh.f32 %v1424_v2 }
 0x646   :  { %v3256_v5 = vpop.eup %3255 }
 0x647   :  { %v1427_v6 = vmul.f32 %v3256_v5, %v1426_v51  ;;  %v1910_v5 = vld [vmem:[%s3860_s6] ss:$0 sm:$0xff] }
 0x649   :  { %v3774_v13 = vadd.f32 %v1428_v10, %v1427_v6 }
 0x64b   :  { %1498 = vmatmul.mubr.f32.vlgmr.msra.gmra.mrb[12].mxu0 %v3774_v13  ;;  %2375 = vmatmul.mubr.f32.vlgmr.msra.gmra.mrb[20].mxu1 %v3774_v13 }
 0x64c   :  { %2850 = vmatpush1.bf16.msra.mxu0 %v3277_v14  ;;  %2881 = vmatpush3.bf16.msra.mxu1 %v3425_v22  ;;  %v3282_v22 = vld [vmem:[#allocation3 + $0x4c] ss:$12 sps:$4 sm:$0xff]  }
 0x64d   :  { %2852 = vmatprep.subr.bf16.mxu0 %v3278_v16  ;;  %2882 = vmatprep.subr.bf16.mxu1 %v3311_v24 }
 0x64e   :  { %1663 = vmatprep.mubr.f32.mxu0 %v3310_v0  ;;  %2409 = vmatprep.mubr.msk.f32.mxu1 %vm3312_vm1, %v3310_v0 }
 0x650   :  { %2854 = vmatpush1.bf16.msra.mxu0 %v3279_v55  ;;  %2884 = vmatpush3.bf16.msra.mxu1 %v3441_v27 }
 0x651   :  { %2856 = vmatprep.subr.bf16.mxu0 %v3280_v18  ;;  %2885 = vmatprep.subr.bf16.mxu1 %v3311_v24 }
 0x654   :  { %2858 = vmatpush1.bf16.msra.mxu0 %v3281_v19  ;;  %2887 = vmatpush3.bf16.msra.mxu1 %v3458_v31 }
 0x655   :  { %2860 = vmatprep.subr.bf16.mxu0 %v3282_v22  ;;  %2888 = vmatprep.subr.bf16.mxu1 %v3311_v24 }
 0x658   :  { %2862 = vmatpush1.bf16.msra.mxu0 %v3420_v20  ;;  %2890 = vmatpush3.bf16.msra.mxu1 %v3475_v35 }
 0x659   :  { %2864 = vmatprep.subr.bf16.mxu0 %v3423_v21  ;;  %2891 = vmatprep.subr.bf16.mxu1 %v3311_v24 }
 0x65c   :  { %2866 = vmatpush1.bf16.msra.mxu0 %v3434_v25  ;;  %2893 = vmatpush3.bf16.msra.mxu1 %v3490_v38 }
 0x65d   :  { %2868 = vmatprep.subr.bf16.mxu0 %v3437_v26  ;;  %2894 = vmatprep.subr.bf16.mxu1 %v3311_v24 }
 0x660   :  { %2870 = vmatpush1.bf16.msra.mxu0 %v3451_v29  ;;  %2896 = vmatpush3.bf16.msra.mxu1 %v3500_v39 }
 0x661   :  { %2872 = vmatprep.subr.bf16.mxu0 %v3454_v30  ;;  %2897 = vmatprep.subr.bf16.mxu1 %v3311_v24 }
 0x664   :  { %2874 = vmatpush1.bf16.msra.mxu0 %v3468_v33  ;;  %2899 = vmatpush3.bf16.msra.mxu1 %v3508_v40 }
 0x665   :  { %2876 = vmatprep.subr.bf16.mxu0 %v3471_v34  ;;  %2900 = vmatprep.subr.bf16.mxu1 %v3311_v24 }
 0x668   :  { %2878 = vmatpush1.bf16.msra.mxu0 %v3485_v37  ;;  %2902 = vmatpush3.bf16.msra.mxu1 %v3514_v41 }
 0x669   :  { %2903 = vmatprep.subr.bf16.mxu0 %v3311_v24 }
 0x71e   :  { %v1499_v20 = vpop.f32.mrb[12].mxu0  ;;  %v1570_v21 = vpop.f32.mrb[20].mxu1 }
 0x71f   :  { %v2939_v25 = vadd.f32 %v1499_v20, %v3567_v1  ;;  %v1501_v26 = vpop.f32.mrb[13].mxu0  ;;  %v2376_v27 = vpop.f32.mrb[21].mxu1  ;;  %v1588_v38 = vadd.f32 %v3576_v28, %v1570_v21 }
 0x720   :  { %v2940_v30 = vadd.f32 %v1501_v26, %v3569_v3 }
 0x721   :  { %v1906_v29 = vmul.f32 -1.442695, %v2939_v25 }
 0x722   :  { %v1907_v31 = vmul.f32 -1.442695, %v2940_v30 }
 0x723   :  { %3257 = vpow2.f32 %v1906_v29 }
 0x724   :  { %3259 = vpow2.f32 %v1907_v31 }
 0x72d   :  { %v3258_v33 = vpop.eup %3257 }
 0x72e   :  { %v1578_v34 = vadd.f32 1.0, %v3258_v33  ;;  %v3260_v35 = vpop.eup %3259 }
 0x72f   :  { %v1585_v37 = vadd.f32 1.0, %v3260_v35 }
 0x730   :  { %3261 = vrcp.f32 %v1578_v34 }
 0x731   :  { %3263 = vrcp.f32 %v1585_v37 }
 0x73a   :  { %v3262_v39 = vpop.eup %3261 }
 0x73b   :  { %v1589_v40 = vmul.f32 %v3262_v39, %v1588_v38  ;;  %v3264_v53 = vpop.eup %3263 }
 0x73c   :  { %v1592_v23 = vsub.f32 1.0, %v3264_v53  ;;  %v1594_v42 = vmul.f32 %v3264_v53, %v3774_v13 }
 0x73d   :  { %v1590_v41 = vadd.f32 %v1589_v40, %v3565_v63  ;;  %v1943_v63 = vld [vmem:[%s3859_s5 + $0x8] sm:$0xff]  }
 0x73f   :  { %3265 = vtanh.f32 %v1590_v41 }
 0x749   :  { %v3266_v32 = vpop.eup %3265 }
 0x74a   :  { %v1593_v36 = vmul.f32 %v3266_v32, %v1592_v23 }
 0x74c   :  { %v1595_v43 = vadd.f32 %v1594_v42, %v1593_v36 }
 0x74e   :  { %1664 = vmatmul.mubr.f32.vlgmr.msra.gmra.mrb[14].mxu0 %v1595_v43  ;;  %2410 = vmatmul.mubr.f32.vlgmr.msra.gmra.mrb[22].mxu1 %v1595_v43 }
 0x74f   :  { %2444 = vmatprep.mubr.msk.f32.mxu0 %vm3312_vm1, %v3310_v0  ;;  %2905 = vmatpush3.bf16.msra.mxu0 %v1912_v44  ;;  %v1945_v0 = vld [vmem:[%s3859_s5 + $0x18] sm:$0xff]  }
 0x750   :  { %2906 = vmatprep.subr.bf16.mxu0 %v3311_v24 }
 0x753   :  { %2908 = vmatpush3.bf16.msra.mxu0 %v1943_v63 }
 0x754   :  { %2909 = vmatprep.subr.bf16.mxu0 %v3311_v24 }
 0x757   :  { %2911 = vmatpush3.bf16.msra.mxu0 %v1944_v45 }
 0x758   :  { %2912 = vmatprep.subr.bf16.mxu0 %v3311_v24 }
 0x75b   :  { %2914 = vmatpush3.bf16.msra.mxu0 %v1945_v0 }
 0x75c   :  { %2915 = vmatprep.subr.bf16.mxu0 %v3311_v24 }
 0x75f   :  { %2917 = vmatpush3.bf16.msra.mxu0 %v1946_v48 }
 0x760   :  { %2918 = vmatprep.subr.bf16.mxu0 %v3311_v24 }
 0x763   :  { %2920 = vmatpush3.bf16.msra.mxu0 %v1947_v47 }
 0x764   :  { %2921 = vmatprep.subr.bf16.mxu0 %v3311_v24 }
 0x767   :  { %2923 = vmatpush3.bf16.msra.mxu0 %v1948_v50 }
 0x768   :  { %2924 = vmatprep.subr.bf16.mxu0 %v3311_v24 }
 0x76b   :  { %2926 = vmatpush3.bf16.msra.mxu0 %v1949_v52 }
 0x821   :  { %v1665_v54 = vpop.f32.mrb[14].mxu0  ;;  %v1736_v8 = vpop.f32.mrb[22].mxu1 }
 0x822   :  { %v2941_v9 = vadd.f32 %v1665_v54, %v3567_v1  ;;  %v1667_v11 = vpop.f32.mrb[15].mxu0  ;;  %v2411_v12 = vpop.f32.mrb[23].mxu1  ;;  %v1754_v49 = vadd.f32 %v3576_v28, %v1736_v8 }
 0x823   :  { %v2942_v17 = vadd.f32 %v1667_v11, %v3569_v3 }
 0x824   :  { %v1908_v15 = vmul.f32 -1.442695, %v2941_v9 }
 0x825   :  { %v1909_v57 = vmul.f32 -1.442695, %v2942_v17 }
 0x826   :  { %3267 = vpow2.f32 %v1908_v15 }
 0x827   :  { %3269 = vpow2.f32 %v1909_v57 }
 0x830   :  { %v3268_v56 = vpop.eup %3267 }
 0x831   :  { %v1744_v58 = vadd.f32 1.0, %v3268_v56  ;;  %v3270_v24 = vpop.eup %3269 }
 0x832   :  { %v1751_v46 = vadd.f32 1.0, %v3270_v24 }
 0x833   :  { %3271 = vrcp.f32 %v1744_v58 }
 0x834   :  { %3273 = vrcp.f32 %v1751_v46 }
 0x83d   :  { %v3272_v59 = vpop.eup %3271 }
 0x83e   :  { %v1755_v7 = vmul.f32 %v3272_v59, %v1754_v49  ;;  %v3274_v61 = vpop.eup %3273 }
 0x83f   :  { %v1758_v62 = vsub.f32 1.0, %v3274_v61  ;;  %v1760_v4 = vmul.f32 %v3274_v61, %v1595_v43 }
 0x840   :  { %v1756_v1 = vadd.f32 %v1755_v7, %v3563_v60 }
 0x842   :  { %3275 = vtanh.f32 %v1756_v1 }
 0x84c   :  { %v3276_v2 = vpop.eup %3275 }
 0x84d   :  { %v1759_v3 = vmul.f32 %v3276_v2, %v1758_v62 }
 0x84f   :  { %v1761_v51 = vadd.f32 %v1760_v4, %v1759_v3 }
 0x851   :  { %2445 = vmatmul.mubr.f32.vlgmr.msra.gmra.mrb[16].mxu0 %v1761_v51 }
 0x924   :  { %v1867_v6 = vpop.f32.mrb[16].mxu0 }
 0x925   :  { %v1868_v10 = vadd.f32 %v1910_v5, %v1867_v6  ;;  %v2446_v28 = vpop.f32.mrb[17].mxu0 }
 0x927   :  { %1871 = vst [vmem:[%s3861_s7] sm:$0xff] %v1868_v10 }
 0x928   :  { %1876 = vsyncpa [#allocation4], 1 }

</bundles_post_ra>
